<compile_context>
chip_gen: v7x
topology: tpu7x:2x2x1
jax: 0.10.0
libtpu: 0.0.40
codegen_flags: <defaults>
</compile_context>

<pallas_src>
import functools

import jax
import jax.numpy as jnp
from jax.experimental import pallas as pl
from jax.experimental.pallas import tpu as pltpu

_LANE = 128
_NEG_BIG = -1e30          # bias for padded logit columns -> exp underflows to 0
_MAX_BLOCK_ROWS = 4096    # VMEM cap: tiles + double buffers + intermediates stay
                          # comfortably under v7x's 32 MiB scoped-VMEM default.


# ----------------------------------------------------------------------------
# Kernel
# ----------------------------------------------------------------------------
def _mlp_kernel(x_ref, w1_ref, b1_ref, w2_ref, b2_ref, w3_ref, b3_ref, o_ref):
    x = x_ref[...]
    w1 = w1_ref[...]
    w2 = w2_ref[...]
    w3 = w3_ref[...]

    # fc1 + ReLU (f32 accumulation on the MXU regardless of input dtype)
    h1 = jnp.dot(x, w1, preferred_element_type=jnp.float32) + b1_ref[...]
    h1 = jnp.maximum(h1, 0.0)

    # fc2 + ReLU (cast activations to the weight dtype so bf16 weights keep the
    # native-MXU-rate path; a no-op for the default f32 path)
    h2 = jnp.dot(h1.astype(w2.dtype), w2,
                 preferred_element_type=jnp.float32) + b2_ref[...]
    h2 = jnp.maximum(h2, 0.0)

    # fc3 -> lane-dense [block_rows, 128] logits; padded columns carry a -1e30
    # bias so they contribute nothing to the max / exp-sum below.
    logits = jnp.dot(h2.astype(w3.dtype), w3,
                     preferred_element_type=jnp.float32) + b3_ref[...]

    # log_softmax along dim=1 (feature axis), numerically stable
    m = jnp.max(logits, axis=1, keepdims=True)
    shifted = logits - m
    lse = jnp.log(jnp.sum(jnp.exp(shifted), axis=1, keepdims=True))
    o_ref[...] = (shifted - lse).astype(o_ref.dtype)


# ----------------------------------------------------------------------------
# Device-aware block-size selection
# ----------------------------------------------------------------------------
def _num_tensorcores_per_chip():
    """2 for v7x / v4 / v5p (megacore-style, one device = 2 TCs); 1 for v5e/v6e."""
    try:
        kind = jax.devices()[0].device_kind.lower()
    except Exception:
        return 1
    if any(t in kind for t in ("v5 lite", "v5e", "v5litepod", "v6 lite", "v6e",
                               "v6litepod")):
        return 1
    if any(t in kind for t in ("v7", "v4", "v5p", "v5")):
        return 2
    return 1


def _choose_block_rows(n, requested, n_tc):
    if requested is not None:
        br = requested
    else:
        # Fewer, fatter grid steps amortize the ~0.35 us per-step cost, but keep
        # at least n_tc steps (and a multiple of n_tc) so all TensorCores get an
        # even share under dimension_semantics=("parallel",).
        steps = max(n_tc, pl.cdiv(n, _MAX_BLOCK_ROWS))
        if n_tc > 1 and steps % n_tc:
            steps += n_tc - (steps % n_tc)
        br = pl.cdiv(n, steps)
    br = min(br, max(n, 8))
    br = max(8, ((br + 7) // 8) * 8)  # multiple of 8 sublanes
    return br


# ----------------------------------------------------------------------------
# Wrapper
# ----------------------------------------------------------------------------
def prepare_params(params, use_bf16_inputs=False):
    """One-time (non-hot-path) prep: pad fc3 to a lane-dense 128-wide output and
    optionally cast weights to bf16 for the MXU. Returns (prepped, out_dim)."""
    out_dim = params["w3"].shape[1]
    out_pad = ((out_dim + _LANE - 1) // _LANE) * _LANE
    w3 = jnp.pad(params["w3"], ((0, 0), (0, out_pad - out_dim)))
    b3 = jnp.pad(params["b3"], ((0, 0), (0, out_pad - out_dim)),
                 constant_values=_NEG_BIG)
    wdt = jnp.bfloat16 if use_bf16_inputs else jnp.float32
    prepped = {
        "w1": params["w1"].astype(wdt),
        "b1": params["b1"].astype(jnp.float32),
        "w2": params["w2"].astype(wdt),
        "b2": params["b2"].astype(jnp.float32),
        "w3": w3.astype(wdt),
        "b3": b3.astype(jnp.float32),
    }
    return prepped, out_dim


@functools.partial(jax.jit,
                   static_argnames=("out_dim", "block_rows", "return_padded"))
def _mlp_forward_impl(x, prepped, *, out_dim, block_rows, return_padded):
    n, in_dim = x.shape
    out_pad = prepped["w3"].shape[1]
    br = block_rows
    grid = (pl.cdiv(n, br),)

    # Halve x DMA bytes if the weights were prepped as bf16.
    x_in = x.astype(prepped["w1"].dtype)

    # Weights/biases are tiny (<50 KiB): constant block index -> VMEM-resident
    # full blocks across every grid step, no extra pipelining.
    def full(arr):
        nd = arr.ndim
        return pl.BlockSpec(arr.shape, lambda i, _nd=nd: (0,) * _nd)

    h1_dim = prepped["w1"].shape[1]
    h2_dim = prepped["w2"].shape[1]
    cost = pl.CostEstimate(
        flops=2 * n * (in_dim * h1_dim + h1_dim * h2_dim + h2_dim * out_pad),
        transcendentals=n * out_pad,  # exp in the softmax epilogue
        bytes_accessed=(x_in.size * x_in.dtype.itemsize
                        + n * out_pad * 4
                        + sum(v.size * v.dtype.itemsize
                              for v in prepped.values())),
    )

    out_padded = pl.pallas_call(
        _mlp_kernel,
        out_shape=jax.ShapeDtypeStruct((n, out_pad), jnp.float32),
        grid_spec=pltpu.PrefetchScalarGridSpec(
            num_scalar_prefetch=0,
            grid=grid,
            in_specs=[
                pl.BlockSpec((br, in_dim), lambda i: (i, 0)),
                full(prepped["w1"]), full(prepped["b1"]),
                full(prepped["w2"]), full(prepped["b2"]),
                full(prepped["w3"]), full(prepped["b3"]),
            ],
            out_specs=pl.BlockSpec((br, out_pad), lambda i: (i, 0)),
        ),
        compiler_params=pltpu.CompilerParams(
            dimension_semantics=("parallel",),  # shards grid steps over v7x's 2 TCs
        ),
        cost_estimate=cost,
    )(x_in, prepped["w1"], prepped["b1"], prepped["w2"], prepped["b2"],
      prepped["w3"], prepped["b3"])

    if return_padded:
        # Columns out_dim..out_pad-1 hold ~-1e30 filler and must not be consumed;
        # returning the slab skips an extra HBM read/write pass over padded data.
        return out_padded
    return out_padded[:, :out_dim]


def mlp_forward(x, prepped, out_dim, *, block_rows=None, return_padded=False):
    """x: [N, in_channels] float32. prepped/out_dim from prepare_params()."""
    n = x.shape[0]
    br = _choose_block_rows(n, block_rows, _num_tensorcores_per_chip())
    return _mlp_forward_impl(x, prepped, out_dim=out_dim, block_rows=br,
                             return_padded=return_padded)


# ----------------------------------------------------------------------------
# Init + pure-JAX reference
# ----------------------------------------------------------------------------
def init_params(key, in_channels, out_channels):
    """Deterministic init matching torch.nn.Linear's U(-1/sqrt(fan_in), +...)."""
    dims = [(in_channels, 64), (64, 32), (32, out_channels)]
    params = {}
    keys = jax.random.split(key, 2 * len(dims))
    for idx, (fan_in, fan_out) in enumerate(dims):
        bound = 1.0 / jnp.sqrt(jnp.float32(fan_in))
        w = jax.random.uniform(keys[2 * idx], (fan_in, fan_out),
                               minval=-bound, maxval=bound, dtype=jnp.float32)
        b = jax.random.uniform(keys[2 * idx + 1], (1, fan_out),
                               minval=-bound, maxval=bound, dtype=jnp.float32)
        params[f"w{idx + 1}"] = w
        params[f"b{idx + 1}"] = b
    return params


def mlp_reference(x, params):
    h = jax.nn.relu(x @ params["w1"] + params["b1"])
    h = jax.nn.relu(h @ params["w2"] + params["b2"])
    logits = h @ params["w3"] + params["b3"]
    return jax.nn.log_softmax(logits, axis=1)


if __name__ == "__main__":
    key = jax.random.PRNGKey(0)
    k_x, k_p = jax.random.split(key)

    N, IN_CHANNELS, OUT_CHANNELS = 512, 16, 8  # small synthetic shapes

    x = jax.random.normal(k_x, (N, IN_CHANNELS), dtype=jnp.float32)
    params = init_params(k_p, IN_CHANNELS, OUT_CHANNELS)

    # One-time prep (fc3 padding) outside the per-call hot path. Set
    # use_bf16_inputs=True for higher MXU rate / half the x DMA bytes if the
    # consumer tolerates bf16-level error (it would loosen the 1e-4 check here).
    prepped, out_dim = prepare_params(params, use_bf16_inputs=False)

    # block_rows auto-selected: grid=1 fat step on v5e/v6e, even grid on v7x.
    out = mlp_forward(x, prepped, out_dim)
    out = jax.block_until_ready(out)

    ref = mlp_reference(x, params)
    assert out.shape == (N, OUT_CHANNELS)
    assert jnp.allclose(out, ref, atol=1e-4, rtol=1e-4)

    print("KERNEL_OK")
</pallas_src>

<mosaic_0001>
module attributes {stable_mosaic.version = 11 : i64} {
  func.func @_mlp_kernel(%arg0: i32, %arg1: memref<512x16xf32, #tpu.memory_space<vmem>>, %arg2: memref<16x64xf32, #tpu.memory_space<vmem>>, %arg3: memref<1x64xf32, #tpu.memory_space<vmem>>, %arg4: memref<64x32xf32, #tpu.memory_space<vmem>>, %arg5: memref<1x32xf32, #tpu.memory_space<vmem>>, %arg6: memref<32x128xf32, #tpu.memory_space<vmem>>, %arg7: memref<1x128xf32, #tpu.memory_space<vmem>>, %arg8: memref<512x128xf32, #tpu.memory_space<vmem>>) attributes {dimension_semantics = [#tpu.dimension_semantics<parallel>], iteration_bounds = array<i64: 1>, scalar_prefetch = 0 : i64, scratch_operands = 0 : i64, tpu.core_type = #tpu.core_type<tc>, window_params = [{transform_indices = @transform_0, window_bounds = array<i64: 512, 16>}, {pipeline_mode = #tpu.pipeline_mode<synchronous>, transform_indices = @transform_1, window_bounds = array<i64: 16, 64>}, {pipeline_mode = #tpu.pipeline_mode<synchronous>, transform_indices = @transform_2, window_bounds = array<i64: 1, 64>}, {pipeline_mode = #tpu.pipeline_mode<synchronous>, transform_indices = @transform_3, window_bounds = array<i64: 64, 32>}, {pipeline_mode = #tpu.pipeline_mode<synchronous>, transform_indices = @transform_4, window_bounds = array<i64: 1, 32>}, {pipeline_mode = #tpu.pipeline_mode<synchronous>, transform_indices = @transform_5, window_bounds = array<i64: 32, 128>}, {pipeline_mode = #tpu.pipeline_mode<synchronous>, transform_indices = @transform_6, window_bounds = array<i64: 1, 128>}, {transform_indices = @transform_7, window_bounds = array<i64: 512, 128>}]} {
    %c0 = arith.constant 0 : index
    %c0_0 = arith.constant 0 : index
    %0 = vector.load %arg1[%c0, %c0_0] : memref<512x16xf32, #tpu.memory_space<vmem>>, vector<512x16xf32>
    %c0_1 = arith.constant 0 : index
    %c0_2 = arith.constant 0 : index
    %1 = vector.load %arg2[%c0_1, %c0_2] : memref<16x64xf32, #tpu.memory_space<vmem>>, vector<16x64xf32>
    %c0_3 = arith.constant 0 : index
    %c0_4 = arith.constant 0 : index
    %2 = vector.load %arg4[%c0_3, %c0_4] : memref<64x32xf32, #tpu.memory_space<vmem>>, vector<64x32xf32>
    %c0_5 = arith.constant 0 : index
    %c0_6 = arith.constant 0 : index
    %3 = vector.load %arg6[%c0_5, %c0_6] : memref<32x128xf32, #tpu.memory_space<vmem>>, vector<32x128xf32>
    %cst = arith.constant dense<0.000000e+00> : vector<512x64xf32>
    %4 = tpu.matmul %0, %1, %cst {dimension_numbers = #tpu.dot_dimension_numbers<[1], [0], [0], [1], [0, 0, 1, 1], [], []>} : vector<512x16xf32>, vector<16x64xf32>, vector<512x64xf32> -> vector<512x64xf32>
    %c0_7 = arith.constant 0 : index
    %c0_8 = arith.constant 0 : index
    %5 = vector.load %arg3[%c0_7, %c0_8] : memref<1x64xf32, #tpu.memory_space<vmem>>, vector<1x64xf32>
    %6 = vector.broadcast %5 : vector<1x64xf32> to vector<512x64xf32>
    %7 = arith.addf %4, %6 : vector<512x64xf32>
    %cst_9 = arith.constant 0.000000e+00 : f32
    %8 = vector.broadcast %cst_9 : f32 to vector<512x64xf32>
    %9 = arith.maximumf %7, %8 : vector<512x64xf32>
    %cst_10 = arith.constant dense<0.000000e+00> : vector<512x32xf32>
    %10 = tpu.matmul %9, %2, %cst_10 {dimension_numbers = #tpu.dot_dimension_numbers<[1], [0], [0], [1], [0, 0, 1, 1], [], []>} : vector<512x64xf32>, vector<64x32xf32>, vector<512x32xf32> -> vector<512x32xf32>
    %c0_11 = arith.constant 0 : index
    %c0_12 = arith.constant 0 : index
    %11 = vector.load %arg5[%c0_11, %c0_12] : memref<1x32xf32, #tpu.memory_space<vmem>>, vector<1x32xf32>
    %12 = vector.broadcast %11 : vector<1x32xf32> to vector<512x32xf32>
    %13 = arith.addf %10, %12 : vector<512x32xf32>
    %cst_13 = arith.constant 0.000000e+00 : f32
    %14 = vector.broadcast %cst_13 : f32 to vector<512x32xf32>
    %15 = arith.maximumf %13, %14 : vector<512x32xf32>
    %cst_14 = arith.constant dense<0.000000e+00> : vector<512x128xf32>
    %16 = tpu.matmul %15, %3, %cst_14 {dimension_numbers = #tpu.dot_dimension_numbers<[1], [0], [0], [1], [0, 0, 1, 1], [], []>} : vector<512x32xf32>, vector<32x128xf32>, vector<512x128xf32> -> vector<512x128xf32>
    %c0_15 = arith.constant 0 : index
    %c0_16 = arith.constant 0 : index
    %17 = vector.load %arg7[%c0_15, %c0_16] : memref<1x128xf32, #tpu.memory_space<vmem>>, vector<1x128xf32>
    %18 = vector.broadcast %17 : vector<1x128xf32> to vector<512x128xf32>
    %19 = arith.addf %16, %18 : vector<512x128xf32>
    %cst_17 = arith.constant dense<0xFF800000> : vector<512xf32>
    %20 = vector.multi_reduction <maximumf>, %19, %cst_17 [1] : vector<512x128xf32> to vector<512xf32>
    %21 = vector.shape_cast %20 : vector<512xf32> to vector<512x1xf32>
    %22 = vector.broadcast %21 : vector<512x1xf32> to vector<512x128xf32>
    %23 = arith.subf %19, %22 : vector<512x128xf32>
    %24 = math.exp %23 : vector<512x128xf32>
    %cst_18 = arith.constant dense<0.000000e+00> : vector<512xf32>
    %25 = vector.multi_reduction <add>, %24, %cst_18 [1] : vector<512x128xf32> to vector<512xf32>
    %26 = vector.shape_cast %25 : vector<512xf32> to vector<512x1xf32>
    %27 = math.log %26 : vector<512x1xf32>
    %28 = vector.broadcast %27 : vector<512x1xf32> to vector<512x128xf32>
    %29 = arith.subf %23, %28 : vector<512x128xf32>
    %c0_19 = arith.constant 0 : index
    %c0_20 = arith.constant 0 : index
    %30 = vector.load %arg8[%c0_19, %c0_20] : memref<512x128xf32, #tpu.memory_space<vmem>>, vector<512x128xf32>
    tpu.vector_store %arg8[%c0_19, %c0_20], %29 {strides = array<i32>} : memref<512x128xf32, #tpu.memory_space<vmem>>, vector<512x128xf32>,
    return
  }
  func.func @transform_0(%arg0: i32) -> (i32, i32) {
    %c0_i32 = arith.constant 0 : i32
    %c0_i32_0 = arith.constant 0 : i32
    return %arg0, %c0_i32 : i32, i32
  }
  func.func @transform_1(%arg0: i32) -> (i32, i32) {
    %c0_i32 = arith.constant 0 : i32
    %c0_i32_0 = arith.constant 0 : i32
    %c0_i32_1 = arith.constant 0 : i32
    return %c0_i32, %c0_i32_0 : i32, i32
  }
  func.func @transform_2(%arg0: i32) -> (i32, i32) {
    %c0_i32 = arith.constant 0 : i32
    %c0_i32_0 = arith.constant 0 : i32
    %c0_i32_1 = arith.constant 0 : i32
    return %c0_i32, %c0_i32_0 : i32, i32
  }
  func.func @transform_3(%arg0: i32) -> (i32, i32) {
    %c0_i32 = arith.constant 0 : i32
    %c0_i32_0 = arith.constant 0 : i32
    %c0_i32_1 = arith.constant 0 : i32
    return %c0_i32, %c0_i32_0 : i32, i32
  }
  func.func @transform_4(%arg0: i32) -> (i32, i32) {
    %c0_i32 = arith.constant 0 : i32
    %c0_i32_0 = arith.constant 0 : i32
    %c0_i32_1 = arith.constant 0 : i32
    return %c0_i32, %c0_i32_0 : i32, i32
  }
  func.func @transform_5(%arg0: i32) -> (i32, i32) {
    %c0_i32 = arith.constant 0 : i32
    %c0_i32_0 = arith.constant 0 : i32
    %c0_i32_1 = arith.constant 0 : i32
    return %c0_i32, %c0_i32_0 : i32, i32
  }
  func.func @transform_6(%arg0: i32) -> (i32, i32) {
    %c0_i32 = arith.constant 0 : i32
    %c0_i32_0 = arith.constant 0 : i32
    %c0_i32_1 = arith.constant 0 : i32
    return %c0_i32, %c0_i32_0 : i32, i32
  }
  func.func @transform_7(%arg0: i32) -> (i32, i32) {
    %c0_i32 = arith.constant 0 : i32
    %c0_i32_0 = arith.constant 0 : i32
    return %arg0, %c0_i32 : i32, i32
  }
}

</mosaic_0001>

<bundles_post_ra>
// kernel: _mlp_forward_impl.1
= control target key start
LH: loop header
LB: loop body
LE: loop exit
PB: predicated region body
PF: predicated region fallthrough
CT: control target
= control target key end

     0   :  { %vm111_vm0 = vcmask 130048   ;;  %vm760_vm1 = vcmask 523264   ;;  %vm1409_vm2 = vcmask 261120   ;;  %s5171_s1 = inlined_call_operand.vmem [shape: f32[16,64], index: 1, kind: input, shape index: {}]   ;;  %s5172_s0 = inlined_call_operand.vmem [shape: f32[512,16], index: 0, kind: input, shape index: {}]   ;;  %s5173_s3 = inlined_call_operand.vmem [shape: f32[64,32], index: 3, kind: input, shape index: {}]   ;;  %s5174_s2 = inlined_call_operand.vmem [shape: f32[1,64], index: 2, kind: input, shape index: {}]   ;;  %s5175_s5 = inlined_call_operand.vmem [shape: f32[32,128], index: 5, kind: input, shape index: {}]   ;;  %s5176_s4 = inlined_call_operand.vmem [shape: f32[1,32], index: 4, kind: input, shape index: {}]   ;;  %s5177_s6 = inlined_call_operand.vmem [shape: f32[1,128], index: 6, kind: input, shape index: {}]   ;;  %s5178_s7 = inlined_call_operand.vmem [shape: f32[512,128], index: 7, kind: output, shape index: {}]  }
   0x1   :  { %v90_v0 = vld [vmem:[%s5171_s1] sm:$0xff]  ;;  %v91_v1 = vld [vmem:[%s5171_s1 + $0x8] sm:$0xff]  ;;  %v28_v5 = vld [vmem:[%s5172_s0 + $0x10] sm:$0xff] }
   0x2   :  { %v26_v2 = vld [vmem:[%s5172_s0] sm:$0xff]  ;;  %v3412_v3 = vpack.c.bf16 %v91_v1, %v90_v0  ;;  %v27_v4 = vld [vmem:[%s5172_s0 + $0x8] sm:$0xff]  ;;  %v29_v6 = vld [vmem:[%s5172_s0 + $0x18] sm:$0xff] }
   0x3   :  { %3100 = vmatprep.mubr.msk.f32.mxu0 %vm111_vm0, %v26_v2  ;;  %v30_v7 = vld [vmem:[%s5172_s0 + $0x20] sm:$0xff]  ;;  %v59_v9 = vld [vmem:[%s5172_s0 + $0x108] sm:$0xff]  ;;  %v60_v11 = vld [vmem:[%s5172_s0 + $0x110] sm:$0xff] }
   0x4   :  { %3413 = vmatprep.subr.bf16.mxu0 %v3412_v3  ;;  %3440 = vmatprep.subr.bf16.mxu1 %v3412_v3  ;;  %v58_v8 = vld [vmem:[%s5172_s0 + $0x100] sm:$0xff]  ;;  %v31_v10 = vld [vmem:[%s5172_s0 + $0x28] sm:$0xff]  ;;  %v32_v12 = vld [vmem:[%s5172_s0 + $0x30] sm:$0xff] }
   0x5   :  { %3415 = vmatpush3.bf16.msra.mxu0 %v3412_v3  ;;  %3441 = vmatpush3.bf16.msra.mxu1 %v3412_v3  ;;  %v61_v13 = vld [vmem:[%s5172_s0 + $0x118] sm:$0xff]  ;;  %v62_v14 = vld [vmem:[%s5172_s0 + $0x120] sm:$0xff]  ;;  %v63_v17 = vld [vmem:[%s5172_s0 + $0x128] sm:$0xff] }
   0x6   :  { %3148 = vmatprep.mubr.msk.f32.mxu1 %vm111_vm0, %v58_v8  ;;  %v33_v15 = vld [vmem:[%s5172_s0 + $0x38] sm:$0xff]  ;;  %v34_v16 = vld [vmem:[%s5172_s0 + $0x40] sm:$0xff]  ;;  %v64_v18 = vld [vmem:[%s5172_s0 + $0x130] sm:$0xff] }
   0x7   :  { %v35_v19 = vld [vmem:[%s5172_s0 + $0x48] sm:$0xff]  ;;  %v36_v20 = vld [vmem:[%s5172_s0 + $0x50] sm:$0xff]  ;;  %v65_v21 = vld [vmem:[%s5172_s0 + $0x138] sm:$0xff] }
   0x8   :  { %3101 = vmatmul.mubr.msk.f32.vlgmr.msra.gmra.mrb[0].mxu0 %vm111_vm0, %v27_v4  ;;  %3149 = vmatmul.mubr.msk.f32.vlgmr.msra.gmra.mrb[0].mxu1 %vm111_vm0, %v59_v9  ;;  %v92_v22 = vld [vmem:[%s5173_s3] sm:$0xff]  ;;  %v93_v23 = vld [vmem:[%s5173_s3 + $0x8] sm:$0xff]  ;;  %v94_v24 = vld [vmem:[%s5173_s3 + $0x10] sm:$0xff] }
   0x9   :  { %3103 = vmatprep.mubr.msk.f32.mxu0 %vm111_vm0, %v28_v5  ;;  %3151 = vmatprep.mubr.msk.f32.mxu1 %vm111_vm0, %v60_v11  ;;  %v66_v25 = vld [vmem:[%s5172_s0 + $0x140] sm:$0xff]  ;;  %v3416_v26 = vpack.c.bf16 %v93_v23, %v92_v22  ;;  %v95_v27 = vld [vmem:[%s5173_s3 + $0x18] sm:$0xff]  ;;  %v97_v31 = vld [vmem:[%s5173_s3 + $0x28] sm:$0xff] }
   0xa   :  { %v37_v28 = vld [vmem:[%s5172_s0 + $0x58] sm:$0xff]  ;;  %v3420_v29 = vpack.c.bf16 %v95_v27, %v94_v24  ;;  %v96_v30 = vld [vmem:[%s5173_s3 + $0x20] sm:$0xff]  ;;  %v67_v33 = vld [vmem:[%s5172_s0 + $0x148] sm:$0xff] }
   0xb   :  { %v38_v32 = vld [vmem:[%s5172_s0 + $0x60] sm:$0xff]  ;;  %3417 = vmatprep.subr.bf16.mxu1 %v3416_v26  ;;  %v68_v34 = vld [vmem:[%s5172_s0 + $0x150] sm:$0xff]  ;;  %v3424_v35 = vpack.c.bf16 %v97_v31, %v96_v30  ;;  %v39_v36 = vld [vmem:[%s5172_s0 + $0x68] sm:$0xff] }
   0xc   :  { %3104 = vmatmul.mubr.msk.f32.gmra.mrb[2].mxu0 %vm111_vm0, %v29_v6  ;;  %3152 = vmatmul.mubr.msk.f32.gmra.mrb[2].mxu1 %vm111_vm0, %v61_v13  ;;  %v98_v37 = vld [vmem:[%s5173_s3 + $0x30] sm:$0xff]  ;;  %v99_v38 = vld [vmem:[%s5173_s3 + $0x38] sm:$0xff]  ;;  %v70_v41 = vld [vmem:[%s5172_s0 + $0x160] sm:$0xff] }
   0xd   :  { %3106 = vmatprep.mubr.msk.f32.mxu0 %vm111_vm0, %v30_v7  ;;  %3154 = vmatprep.mubr.msk.f32.mxu1 %vm111_vm0, %v62_v14  ;;  %v40_v39 = vld [vmem:[%s5172_s0 + $0x70] sm:$0xff]  ;;  %v69_v40 = vld [vmem:[%s5172_s0 + $0x158] sm:$0xff]  ;;  %v3428_v42 = vpack.c.bf16 %v99_v38, %v98_v37  ;;  %v42_v44 = vld [vmem:[%s5172_s0 + $0x80] sm:$0xff] }
   0xe   :  { %3419 = vmatpush3.bf16.msra.mxu1 %v3416_v26  ;;  %v41_v43 = vld [vmem:[%s5172_s0 + $0x78] sm:$0xff]  ;;  %v71_v45 = vld [vmem:[%s5172_s0 + $0x168] sm:$0xff]  ;;  %v72_v46 = vld [vmem:[%s5172_s0 + $0x170] sm:$0xff] }
   0xf   :  { %3421 = vmatprep.subr.bf16.mxu1 %v3420_v29  ;;  %v43_v47 = vld [vmem:[%s5172_s0 + $0x88] sm:$0xff]  ;;  %v44_v48 = vld [vmem:[%s5172_s0 + $0x90] sm:$0xff]  ;;  %v73_v49 = vld [vmem:[%s5172_s0 + $0x178] sm:$0xff] }
  0x10   :  { %3107 = vmatmul.mubr.msk.f32.gmra.mrb[4].mxu0 %vm111_vm0, %v31_v10  ;;  %3155 = vmatmul.mubr.msk.f32.gmra.mrb[4].mxu1 %vm111_vm0, %v63_v17  ;;  %v74_v50 = vld [vmem:[%s5172_s0 + $0x180] sm:$0xff]  ;;  %v45_v51 = vld [vmem:[%s5172_s0 + $0x98] sm:$0xff]  ;;  %v75_v53 = vld [vmem:[%s5172_s0 + $0x188] sm:$0xff] }
  0x11   :  { %3109 = vmatprep.mubr.msk.f32.mxu0 %vm111_vm0, %v32_v12  ;;  %3157 = vmatprep.mubr.msk.f32.mxu1 %vm111_vm0, %v64_v18  ;;  %v46_v52 = vld [vmem:[%s5172_s0 + $0xa0] sm:$0xff]  ;;  %v76_v54 = vld [vmem:[%s5172_s0 + $0x190] sm:$0xff]  ;;  %v47_v55 = vld [vmem:[%s5172_s0 + $0xa8] sm:$0xff] }
  0x12   :  { %3423 = vmatpush3.bf16.msra.mxu1 %v3420_v29  ;;  %v48_v56 = vld [vmem:[%s5172_s0 + $0xb0] sm:$0xff]  ;;  %v77_v57 = vld [vmem:[%s5172_s0 + $0x198] sm:$0xff]  ;;  %v78_v58 = vld [vmem:[%s5172_s0 + $0x1a0] sm:$0xff] }
  0x13   :  { %3425 = vmatprep.subr.bf16.mxu1 %v3424_v35  ;;  %v49_v59 = vld [vmem:[%s5172_s0 + $0xb8] sm:$0xff]  ;;  %v50_v60 = vld [vmem:[%s5172_s0 + $0xc0] sm:$0xff]  ;;  %v79_v61 = vld [vmem:[%s5172_s0 + $0x1a8] sm:$0xff] }
  0x14   :  { %3110 = vmatmul.mubr.msk.f32.gmra.mrb[6].mxu0 %vm111_vm0, %v33_v15  ;;  %3158 = vmatmul.mubr.msk.f32.gmra.mrb[6].mxu1 %vm111_vm0, %v65_v21  ;;  %v80_v62 = vld [vmem:[%s5172_s0 + $0x1b0] sm:$0xff]  ;;  %v51_v63 = vld [vmem:[%s5172_s0 + $0xc8] sm:$0xff]  ;;  %v81_v1 = vld [vmem:[%s5172_s0 + $0x1b8] sm:$0xff] }
  0x15   :  { %3112 = vmatprep.mubr.msk.f32.mxu0 %vm111_vm0, %v34_v16  ;;  %3160 = vmatprep.mubr.msk.f32.mxu1 %vm111_vm0, %v66_v25  ;;  %v52_v0 = vld [vmem:[%s5172_s0 + $0xd0] sm:$0xff]  ;;  %v82_v2 = vld [vmem:[%s5172_s0 + $0x1c0] sm:$0xff]  ;;  %v53_v3 = vld [vmem:[%s5172_s0 + $0xd8] sm:$0xff] }
  0x16   :  { %3427 = vmatpush3.bf16.msra.mxu1 %v3424_v35  ;;  %v54_v4 = vld [vmem:[%s5172_s0 + $0xe0] sm:$0xff]  ;;  %v83_v5 = vld [vmem:[%s5172_s0 + $0x1c8] sm:$0xff]  ;;  %v84_v6 = vld [vmem:[%s5172_s0 + $0x1d0] sm:$0xff] }
  0x17   :  { %3429 = vmatprep.subr.bf16.mxu1 %v3428_v42  ;;  %v55_v7 = vld [vmem:[%s5172_s0 + $0xe8] sm:$0xff]  ;;  %v56_v8 = vld [vmem:[%s5172_s0 + $0xf0] sm:$0xff]  ;;  %v85_v9 = vld [vmem:[%s5172_s0 + $0x1d8] sm:$0xff] }
  0x18   :  { %3113 = vmatmul.mubr.msk.f32.gmra.mrb[8].mxu0 %vm111_vm0, %v35_v19  ;;  %3161 = vmatmul.mubr.msk.f32.gmra.mrb[8].mxu1 %vm111_vm0, %v67_v33  ;;  %v86_v10 = vld [vmem:[%s5172_s0 + $0x1e0] sm:$0xff]  ;;  %v57_v11 = vld [vmem:[%s5172_s0 + $0xf8] sm:$0xff]  ;;  %v87_v12 = vld [vmem:[%s5172_s0 + $0x1e8] sm:$0xff] }
  0x19   :  { %3115 = vmatprep.mubr.msk.f32.mxu0 %vm111_vm0, %v36_v20  ;;  %3163 = vmatprep.mubr.msk.f32.mxu1 %vm111_vm0, %v68_v34  ;;  %v88_v13 = vld [vmem:[%s5172_s0 + $0x1f0] sm:$0xff]  ;;  %v89_v14 = vld [vmem:[%s5172_s0 + $0x1f8] sm:$0xff]  ;;  %v4027_v15 = vld [vmem:[%s5174_s2] ss:$0 sm:$0xff] }
  0x1a   :  { %3431 = vmatpush3.bf16.msra.mxu1 %v3428_v42  ;;  %v100_v22 = vld [vmem:[%s5175_s5] sm:$0xff]  ;;  %v101_v23 = vld [vmem:[%s5175_s5 + $0x8] sm:$0xff]  ;;  %v102_v24 = vld [vmem:[%s5175_s5 + $0x10] sm:$0xff] }
  0x1b   :  { %v103_v29 = vld [vmem:[%s5175_s5 + $0x18] sm:$0xff] }
  0x1c   :  { %3116 = vmatmul.mubr.msk.f32.gmra.mrb[10].mxu0 %vm111_vm0, %v37_v28  ;;  %3164 = vmatmul.mubr.msk.f32.gmra.mrb[10].mxu1 %vm111_vm0, %v69_v40  ;;  %v3432_v28 = vpack.c.bf16 %v101_v23, %v100_v22 }
  0x1d   :  { %3118 = vmatprep.mubr.msk.f32.mxu0 %vm111_vm0, %v38_v32  ;;  %3166 = vmatprep.mubr.msk.f32.mxu1 %vm111_vm0, %v70_v41  ;;  %v3436_v32 = vpack.c.bf16 %v103_v29, %v102_v24 }
  0x1e   :  { %3433 = vmatprep.subr.bf16.mxu0 %v3432_v28 }
  0x1f   :  { %3435 = vmatpush3.bf16.msra.mxu0 %v3432_v28 }
  0x20   :  { %3119 = vmatmul.mubr.msk.f32.gmra.mrb[12].mxu0 %vm111_vm0, %v39_v36  ;;  %3167 = vmatmul.mubr.msk.f32.gmra.mrb[12].mxu1 %vm111_vm0, %v71_v45 }
  0x21   :  { %3121 = vmatprep.mubr.msk.f32.mxu0 %vm111_vm0, %v40_v39  ;;  %3169 = vmatprep.mubr.msk.f32.mxu1 %vm111_vm0, %v72_v46 }
  0x22   :  { %3437 = vmatprep.subr.bf16.mxu0 %v3436_v32 }
  0x23   :  { %3439 = vmatpush3.bf16.msra.mxu0 %v3436_v32 }
  0x24   :  { %3122 = vmatmul.mubr.msk.f32.gmra.mrb[14].mxu0 %vm111_vm0, %v41_v43  ;;  %3170 = vmatmul.mubr.msk.f32.gmra.mrb[14].mxu1 %vm111_vm0, %v73_v49 }
  0x25   :  { %3124 = vmatprep.mubr.msk.f32.mxu0 %vm111_vm0, %v42_v44  ;;  %3172 = vmatprep.mubr.msk.f32.mxu1 %vm111_vm0, %v74_v50 }
  0x28   :  { %3125 = vmatmul.mubr.msk.f32.gmra.mrb[16].mxu0 %vm111_vm0, %v43_v47  ;;  %3173 = vmatmul.mubr.msk.f32.gmra.mrb[16].mxu1 %vm111_vm0, %v75_v53 }
  0x29   :  { %3127 = vmatprep.mubr.msk.f32.mxu0 %vm111_vm0, %v44_v48  ;;  %3175 = vmatprep.mubr.msk.f32.mxu1 %vm111_vm0, %v76_v54 }
  0x2c   :  { %3128 = vmatmul.mubr.msk.f32.gmra.mrb[18].mxu0 %vm111_vm0, %v45_v51  ;;  %3176 = vmatmul.mubr.msk.f32.gmra.mrb[18].mxu1 %vm111_vm0, %v77_v57 }
  0x2d   :  { %3130 = vmatprep.mubr.msk.f32.mxu0 %vm111_vm0, %v46_v52  ;;  %3178 = vmatprep.mubr.msk.f32.mxu1 %vm111_vm0, %v78_v58 }
  0x30   :  { %3131 = vmatmul.mubr.msk.f32.gmra.mrb[20].mxu0 %vm111_vm0, %v47_v55  ;;  %3179 = vmatmul.mubr.msk.f32.gmra.mrb[20].mxu1 %vm111_vm0, %v79_v61 }
  0x31   :  { %3133 = vmatprep.mubr.msk.f32.mxu0 %vm111_vm0, %v48_v56  ;;  %3181 = vmatprep.mubr.msk.f32.mxu1 %vm111_vm0, %v80_v62 }
  0x34   :  { %3134 = vmatmul.mubr.msk.f32.gmra.mrb[22].mxu0 %vm111_vm0, %v49_v59  ;;  %3182 = vmatmul.mubr.msk.f32.gmra.mrb[22].mxu1 %vm111_vm0, %v81_v1 }
  0x35   :  { %3136 = vmatprep.mubr.msk.f32.mxu0 %vm111_vm0, %v50_v60  ;;  %3184 = vmatprep.mubr.msk.f32.mxu1 %vm111_vm0, %v82_v2 }
  0x38   :  { %3137 = vmatmul.mubr.msk.f32.gmra.mrb[24].mxu0 %vm111_vm0, %v51_v63  ;;  %3185 = vmatmul.mubr.msk.f32.gmra.mrb[24].mxu1 %vm111_vm0, %v83_v5 }
  0x39   :  { %3139 = vmatprep.mubr.msk.f32.mxu0 %vm111_vm0, %v52_v0  ;;  %3187 = vmatprep.mubr.msk.f32.mxu1 %vm111_vm0, %v84_v6 }
  0x3c   :  { %3140 = vmatmul.mubr.msk.f32.gmra.mrb[26].mxu0 %vm111_vm0, %v53_v3  ;;  %3188 = vmatmul.mubr.msk.f32.gmra.mrb[26].mxu1 %vm111_vm0, %v85_v9 }
  0x3d   :  { %3142 = vmatprep.mubr.msk.f32.mxu0 %vm111_vm0, %v54_v4  ;;  %3190 = vmatprep.mubr.msk.f32.mxu1 %vm111_vm0, %v86_v10 }
  0x40   :  { %3143 = vmatmul.mubr.msk.f32.gmra.mrb[28].mxu0 %vm111_vm0, %v55_v7  ;;  %3191 = vmatmul.mubr.msk.f32.gmra.mrb[28].mxu1 %vm111_vm0, %v87_v12 }
  0x41   :  { %3145 = vmatprep.mubr.msk.f32.mxu0 %vm111_vm0, %v56_v8  ;;  %3193 = vmatprep.mubr.msk.f32.mxu1 %vm111_vm0, %v88_v13 }
  0x44   :  { %3146 = vmatmul.mubr.msk.f32.gmra.mrb[30].mxu0 %vm111_vm0, %v57_v11  ;;  %3194 = vmatmul.mubr.msk.f32.gmra.mrb[30].mxu1 %vm111_vm0, %v89_v14 }
  0xdb   :  { %v3102_v16 = vpop.f32.mrb[0].mxu0  ;;  %v4046_v31 = vpop.f32.mrb[0].mxu1 }
  0xdc   :  { %v376_v17 = vadd.f32 %v3102_v16, %v4027_v15  ;;  %v370_v18 = vpop.f32.mrb[1].mxu0  ;;  %v4049_v33 = vpop.f32.mrb[1].mxu1 }
  0xdd   :  { %v371_v19 = vadd.f32 %v4027_v15, %v370_v18 }
  0xde   :  { %v690_v25 = vmax.f32 %v376_v17, 0.0 }
  0xdf   :  { %v689_v20 = vmax.f32 %v371_v19, 0.0  ;;  %v3105_v21 = vpop.f32.mrb[2].mxu0  ;;  %v4054_v40 = vpop.f32.mrb[2].mxu1 }
  0xe0   :  { %v386_v26 = vadd.f32 %v3105_v21, %v4027_v15  ;;  %v380_v27 = vpop.f32.mrb[3].mxu0  ;;  %v4057_v42 = vpop.f32.mrb[3].mxu1 }
  0xe1   :  { %v381_v30 = vadd.f32 %v4027_v15, %v380_v27  ;;  %3212 = vmatprep.mubr.msk.f32.mxu1 %vm760_vm1, %v689_v20 }
  0xe2   :  { %3213 = vmatmul.mubr.msk.f32.vlgmr.msra.gmra.mrb[32].mxu1 %vm760_vm1, %v690_v25  ;;  %v692_v36 = vmax.f32 %v386_v26, 0.0 }
  0xe3   :  { %v691_v34 = vmax.f32 %v381_v30, 0.0  ;;  %v3108_v35 = vpop.f32.mrb[4].mxu0  ;;  %v4062_v48 = vpop.f32.mrb[4].mxu1 }
  0xe4   :  { %v396_v37 = vadd.f32 %v3108_v35, %v4027_v15  ;;  %v390_v38 = vpop.f32.mrb[5].mxu0  ;;  %v4065_v50 = vpop.f32.mrb[5].mxu1 }
  0xe5   :  { %v391_v39 = vadd.f32 %v4027_v15, %v390_v38  ;;  %3215 = vmatprep.mubr.msk.f32.mxu1 %vm760_vm1, %v691_v34 }
  0xe6   :  { %v694_v41 = vmax.f32 %v396_v37, 0.0  ;;  %3216 = vmatmul.mubr.msk.f32.gmra.mrb[34].mxu1 %vm760_vm1, %v692_v36 }
  0xe7   :  { %v693_v43 = vmax.f32 %v391_v39, 0.0  ;;  %v3111_v44 = vpop.f32.mrb[6].mxu0  ;;  %v4070_v56 = vpop.f32.mrb[6].mxu1 }
  0xe8   :  { %v406_v45 = vadd.f32 %v3111_v44, %v4027_v15  ;;  %v400_v46 = vpop.f32.mrb[7].mxu0  ;;  %v4073_v58 = vpop.f32.mrb[7].mxu1 }
  0xe9   :  { %v401_v47 = vadd.f32 %v4027_v15, %v400_v46  ;;  %3218 = vmatprep.mubr.msk.f32.mxu1 %vm760_vm1, %v693_v43 }
  0xea   :  { %v696_v49 = vmax.f32 %v406_v45, 0.0  ;;  %3219 = vmatmul.mubr.msk.f32.gmra.mrb[36].mxu1 %vm760_vm1, %v694_v41 }
  0xeb   :  { %v695_v51 = vmax.f32 %v401_v47, 0.0  ;;  %v3114_v52 = vpop.f32.mrb[8].mxu0  ;;  %v4078_v0 = vpop.f32.mrb[8].mxu1 }
  0xec   :  { %v416_v53 = vadd.f32 %v3114_v52, %v4027_v15  ;;  %v410_v54 = vpop.f32.mrb[9].mxu0  ;;  %v4081_v2 = vpop.f32.mrb[9].mxu1 }
  0xed   :  { %v411_v55 = vadd.f32 %v4027_v15, %v410_v54  ;;  %3221 = vmatprep.mubr.msk.f32.mxu1 %vm760_vm1, %v695_v51 }
  0xee   :  { %v698_v57 = vmax.f32 %v416_v53, 0.0  ;;  %3222 = vmatmul.mubr.msk.f32.gmra.mrb[38].mxu1 %vm760_vm1, %v696_v49 }
  0xef   :  { %v697_v59 = vmax.f32 %v411_v55, 0.0  ;;  %v3117_v60 = vpop.f32.mrb[10].mxu0  ;;  %v4086_v8 = vpop.f32.mrb[10].mxu1 }
  0xf0   :  { %v426_v61 = vadd.f32 %v3117_v60, %v4027_v15  ;;  %v420_v62 = vpop.f32.mrb[11].mxu0  ;;  %v4089_v10 = vpop.f32.mrb[11].mxu1 }
  0xf1   :  { %v421_v63 = vadd.f32 %v4027_v15, %v420_v62  ;;  %3224 = vmatprep.mubr.msk.f32.mxu1 %vm760_vm1, %v697_v59 }
  0xf2   :  { %v700_v1 = vmax.f32 %v426_v61, 0.0  ;;  %3225 = vmatmul.mubr.msk.f32.gmra.mrb[40].mxu1 %vm760_vm1, %v698_v57 }
  0xf3   :  { %v699_v3 = vmax.f32 %v421_v63, 0.0  ;;  %v3120_v4 = vpop.f32.mrb[12].mxu0  ;;  %v4094_v17 = vpop.f32.mrb[12].mxu1 }
  0xf4   :  { %v436_v5 = vadd.f32 %v3120_v4, %v4027_v15  ;;  %v430_v6 = vpop.f32.mrb[13].mxu0  ;;  %v4097_v19 = vpop.f32.mrb[13].mxu1 }
  0xf5   :  { %v431_v7 = vadd.f32 %v4027_v15, %v430_v6  ;;  %3227 = vmatprep.mubr.msk.f32.mxu1 %vm760_vm1, %v699_v3 }
  0xf6   :  { %v702_v9 = vmax.f32 %v436_v5, 0.0  ;;  %3228 = vmatmul.mubr.msk.f32.gmra.mrb[42].mxu1 %vm760_vm1, %v700_v1 }
  0xf7   :  { %v701_v11 = vmax.f32 %v431_v7, 0.0  ;;  %v3123_v12 = vpop.f32.mrb[14].mxu0  ;;  %v4102_v25 = vpop.f32.mrb[14].mxu1 }
  0xf8   :  { %v446_v13 = vadd.f32 %v3123_v12, %v4027_v15  ;;  %v440_v14 = vpop.f32.mrb[15].mxu0  ;;  %v4105_v27 = vpop.f32.mrb[15].mxu1 }
  0xf9   :  { %v441_v16 = vadd.f32 %v4027_v15, %v440_v14  ;;  %3230 = vmatprep.mubr.msk.f32.mxu1 %vm760_vm1, %v701_v11 }
  0xfa   :  { %v704_v18 = vmax.f32 %v446_v13, 0.0  ;;  %3231 = vmatmul.mubr.msk.f32.gmra.mrb[44].mxu1 %vm760_vm1, %v702_v9 }
  0xfb   :  { %v703_v20 = vmax.f32 %v441_v16, 0.0  ;;  %v3126_v21 = vpop.f32.mrb[16].mxu0  ;;  %v4110_v35 = vpop.f32.mrb[16].mxu1 }
  0xfc   :  { %v456_v22 = vadd.f32 %v3126_v21, %v4027_v15  ;;  %v450_v23 = vpop.f32.mrb[17].mxu0  ;;  %v4113_v37 = vpop.f32.mrb[17].mxu1 }
  0xfd   :  { %v451_v24 = vadd.f32 %v4027_v15, %v450_v23  ;;  %3233 = vmatprep.mubr.msk.f32.mxu1 %vm760_vm1, %v703_v20 }
  0xfe   :  { %v706_v26 = vmax.f32 %v456_v22, 0.0  ;;  %3234 = vmatmul.mubr.msk.f32.gmra.mrb[46].mxu1 %vm760_vm1, %v704_v18 }
  0xff   :  { %v705_v28 = vmax.f32 %v451_v24, 0.0  ;;  %v3129_v29 = vpop.f32.mrb[18].mxu0  ;;  %v4118_v45 = vpop.f32.mrb[18].mxu1 }
 0x100   :  { %v466_v30 = vadd.f32 %v3129_v29, %v4027_v15  ;;  %v460_v32 = vpop.f32.mrb[19].mxu0  ;;  %v4121_v47 = vpop.f32.mrb[19].mxu1 }
 0x101   :  { %v461_v34 = vadd.f32 %v4027_v15, %v460_v32  ;;  %3236 = vmatprep.mubr.msk.f32.mxu1 %vm760_vm1, %v705_v28  ;;  %v531_v32 = vadd.f32 %v4027_v15, %v4049_v33  ;;  %v541_v33 = vadd.f32 %v4027_v15, %v4057_v42  ;;  %v556_v42 = vadd.f32 %v4062_v48, %v4027_v15 }
 0x102   :  { %v708_v36 = vmax.f32 %v466_v30, 0.0  ;;  %3237 = vmatmul.mubr.msk.f32.gmra.mrb[48].mxu1 %vm760_vm1, %v706_v26  ;;  %v576_v48 = vadd.f32 %v4078_v0, %v4027_v15  ;;  %v596_v0 = vadd.f32 %v4094_v17, %v4027_v15  ;;  %v616_v17 = vadd.f32 %v4110_v35, %v4027_v15 }
 0x103   :  { %v707_v38 = vmax.f32 %v461_v34, 0.0  ;;  %v3132_v39 = vpop.f32.mrb[20].mxu0  ;;  %v4126_v55 = vpop.f32.mrb[20].mxu1 }
 0x104   :  { %v476_v41 = vadd.f32 %v3132_v39, %v4027_v15  ;;  %v470_v43 = vpop.f32.mrb[21].mxu0  ;;  %v4129_v59 = vpop.f32.mrb[21].mxu1  ;;  %v636_v35 = vadd.f32 %v4126_v55, %v4027_v15 }
 0x105   :  { %v471_v44 = vadd.f32 %v4027_v15, %v470_v43  ;;  %3239 = vmatprep.mubr.msk.f32.mxu1 %vm760_vm1, %v707_v38  ;;  %v536_v43 = vadd.f32 %v4046_v31, %v4027_v15  ;;  %v723_v31 = vmax.f32 %v541_v33, 0.0 }
 0x106   :  { %v710_v46 = vmax.f32 %v476_v41, 0.0  ;;  %3240 = vmatmul.mubr.msk.f32.gmra.mrb[50].mxu1 %vm760_vm1, %v708_v36 }
 0x107   :  { %v709_v49 = vmax.f32 %v471_v44, 0.0  ;;  %v3135_v51 = vpop.f32.mrb[22].mxu0  ;;  %v4134_v3 = vpop.f32.mrb[22].mxu1 }
 0x108   :  { %v486_v52 = vadd.f32 %v3135_v51, %v4027_v15  ;;  %v480_v53 = vpop.f32.mrb[23].mxu0  ;;  %v4137_v5 = vpop.f32.mrb[23].mxu1 }
 0x109   :  { %v481_v54 = vadd.f32 %v4027_v15, %v480_v53  ;;  %3242 = vmatprep.mubr.msk.f32.mxu1 %vm760_vm1, %v709_v49  ;;  %v721_v49 = vmax.f32 %v531_v32, 0.0  ;;  %v546_v53 = vadd.f32 %v4054_v40, %v4027_v15  ;;  %v561_v40 = vadd.f32 %v4027_v15, %v4073_v58 }
 0x10a   :  { %v712_v57 = vmax.f32 %v486_v52, 0.0  ;;  %3243 = vmatmul.mubr.msk.f32.gmra.mrb[52].mxu1 %vm760_vm1, %v710_v46  ;;  %v722_v52 = vmax.f32 %v536_v43, 0.0  ;;  %v581_v58 = vadd.f32 %v4027_v15, %v4089_v10  ;;  %v601_v10 = vadd.f32 %v4027_v15, %v4105_v27 }
 0x10b   :  { %v711_v60 = vmax.f32 %v481_v54, 0.0  ;;  %v3138_v61 = vpop.f32.mrb[24].mxu0  ;;  %v4142_v13 = vpop.f32.mrb[24].mxu1  ;;  %v621_v27 = vadd.f32 %v4027_v15, %v4121_v47  ;;  %v641_v47 = vadd.f32 %v4027_v15, %v4137_v5 }
 0x10c   :  { %v496_v62 = vadd.f32 %v3138_v61, %v4027_v15  ;;  %v490_v63 = vpop.f32.mrb[25].mxu0  ;;  %v4145_v16 = vpop.f32.mrb[25].mxu1  ;;  %v656_v55 = vadd.f32 %v4142_v13, %v4027_v15 }
 0x10d   :  { %v491_v1 = vadd.f32 %v4027_v15, %v490_v63  ;;  %3245 = vmatprep.mubr.msk.f32.mxu1 %vm760_vm1, %v711_v60  ;;  %v724_v60 = vmax.f32 %v546_v53, 0.0  ;;  %v566_v63 = vadd.f32 %v4070_v56, %v4027_v15  ;;  %v586_v56 = vadd.f32 %v4086_v8, %v4027_v15 }
 0x10e   :  { %v714_v4 = vmax.f32 %v496_v62, 0.0  ;;  %3246 = vmatmul.mubr.msk.f32.gmra.mrb[54].mxu1 %vm760_vm1, %v712_v57  ;;  %v551_v57 = vadd.f32 %v4027_v15, %v4065_v50  ;;  %v726_v62 = vmax.f32 %v556_v42, 0.0  ;;  %v571_v50 = vadd.f32 %v4027_v15, %v4081_v2 }
 0x10f   :  { %v713_v6 = vmax.f32 %v491_v1, 0.0  ;;  %v3141_v7 = vpop.f32.mrb[26].mxu0  ;;  %v4150_v24 = vpop.f32.mrb[26].mxu1  ;;  %v727_v1 = vmax.f32 %v561_v40, 0.0  ;;  %v591_v2 = vadd.f32 %v4027_v15, %v4097_v19  ;;  %v606_v8 = vadd.f32 %v4102_v25, %v4027_v15 }
 0x110   :  { %v506_v9 = vadd.f32 %v3141_v7, %v4027_v15  ;;  %v500_v11 = vpop.f32.mrb[27].mxu0  ;;  %v4153_v28 = vpop.f32.mrb[27].mxu1  ;;  %v725_v61 = vmax.f32 %v551_v57, 0.0  ;;  %v730_v7 = vmax.f32 %v576_v48, 0.0  ;;  %v611_v19 = vadd.f32 %v4027_v15, %v4113_v37 }
 0x111   :  { %v501_v12 = vadd.f32 %v4027_v15, %v500_v11  ;;  %3248 = vmatprep.mubr.msk.f32.mxu1 %vm760_vm1, %v713_v6  ;;  %v729_v6 = vmax.f32 %v571_v50, 0.0  ;;  %v732_v11 = vmax.f32 %v586_v56, 0.0  ;;  %v626_v25 = vadd.f32 %v4118_v45, %v4027_v15 }
 0x112   :  { %v716_v14 = vmax.f32 %v506_v9, 0.0  ;;  %3249 = vmatmul.mubr.msk.f32.gmra.mrb[56].mxu1 %vm760_vm1, %v714_v4  ;;  %v728_v4 = vmax.f32 %v566_v63, 0.0  ;;  %v731_v9 = vmax.f32 %v581_v58, 0.0  ;;  %v631_v37 = vadd.f32 %v4027_v15, %v4129_v59 }
 0x113   :  { %v715_v18 = vmax.f32 %v501_v12, 0.0  ;;  %v3144_v20 = vpop.f32.mrb[28].mxu0  ;;  %v4160_v39 = vpop.f32.mrb[28].mxu1  ;;  %v733_v12 = vmax.f32 %v591_v2, 0.0  ;;  %v646_v45 = vadd.f32 %v4134_v3, %v4027_v15  ;;  %v743_v32 = vmax.f32 %v641_v47, 0.0 }
 0x114   :  { %v516_v21 = vadd.f32 %v3144_v20, %v4027_v15  ;;  %v510_v22 = vpop.f32.mrb[29].mxu0  ;;  %v4165_v44 = vpop.f32.mrb[29].mxu1  ;;  %v736_v20 = vmax.f32 %v606_v8, 0.0  ;;  %v651_v59 = vadd.f32 %v4027_v15, %v4145_v16  ;;  %v661_v5 = vadd.f32 %v4027_v15, %v4153_v28 }
 0x115   :  { %v511_v23 = vadd.f32 %v4027_v15, %v510_v22  ;;  %3251 = vmatprep.mubr.msk.f32.mxu1 %vm760_vm1, %v715_v18  ;;  %v735_v18 = vmax.f32 %v601_v10, 0.0  ;;  %v738_v22 = vmax.f32 %v616_v17, 0.0  ;;  %v666_v3 = vadd.f32 %v4150_v24, %v4027_v15 }
 0x116   :  { %v718_v26 = vmax.f32 %v516_v21, 0.0  ;;  %3252 = vmatmul.mubr.msk.f32.gmra.mrb[58].mxu1 %vm760_vm1, %v716_v14  ;;  %v734_v14 = vmax.f32 %v596_v0, 0.0  ;;  %v737_v21 = vmax.f32 %v611_v19, 0.0  ;;  %v671_v16 = vadd.f32 %v4027_v15, %v4165_v44 }
 0x117   :  { %v717_v29 = vmax.f32 %v511_v23, 0.0  ;;  %v3147_v30 = vpop.f32.mrb[30].mxu0  ;;  %v4170_v51 = vpop.f32.mrb[30].mxu1  ;;  %v739_v23 = vmax.f32 %v621_v27, 0.0  ;;  %v748_v43 = vmax.f32 %v666_v3, 0.0  ;;  %v676_v13 = vadd.f32 %v4160_v39, %v4027_v15 }
 0x118   :  { %v526_v34 = vadd.f32 %v3147_v30, %v4027_v15  ;;  %v520_v36 = vpop.f32.mrb[31].mxu0  ;;  %v4175_v54 = vpop.f32.mrb[31].mxu1  ;;  %v742_v30 = vmax.f32 %v636_v35, 0.0  ;;  %v686_v24 = vadd.f32 %v4170_v51, %v4027_v15  ;;  %v4268_v39 = vld [vmem:[%s5176_s4] ss:$0 sm:$0xff] }
 0x119   :  { %v521_v38 = vadd.f32 %v4027_v15, %v520_v36  ;;  %3254 = vmatprep.mubr.msk.f32.mxu1 %vm760_vm1, %v717_v29  ;;  %v741_v29 = vmax.f32 %v631_v37, 0.0  ;;  %v745_v36 = vmax.f32 %v651_v59, 0.0  ;;  %v681_v28 = vadd.f32 %v4027_v15, %v4175_v54 }
 0x11a   :  { %v720_v41 = vmax.f32 %v526_v34, 0.0  ;;  %3255 = vmatmul.mubr.msk.f32.gmra.mrb[60].mxu1 %vm760_vm1, %v718_v26  ;;  %v740_v26 = vmax.f32 %v626_v25, 0.0  ;;  %v744_v34 = vmax.f32 %v646_v45, 0.0  ;;  %v752_v44 = vmax.f32 %v686_v24, 0.0 }
 0x11b   :  { %v719_v46 = vmax.f32 %v521_v38, 0.0  ;;  %v746_v38 = vmax.f32 %v656_v55, 0.0  ;;  %v751_v33 = vmax.f32 %v681_v28, 0.0 }
 0x11d   :  { %3257 = vmatprep.mubr.msk.f32.mxu1 %vm760_vm1, %v719_v46  ;;  %v749_v46 = vmax.f32 %v671_v16, 0.0 }
 0x11e   :  { %3258 = vmatmul.mubr.msk.f32.gmra.mrb[62].mxu1 %vm760_vm1, %v720_v41  ;;  %v747_v41 = vmax.f32 %v661_v5, 0.0 }
 0x11f   :  { %3260 = vmatprep.mubr.msk.f32.mxu1 %vm760_vm1, %v721_v49  ;;  %v750_v49 = vmax.f32 %v676_v13, 0.0 }
 0x122   :  { %3261 = vmatmul.mubr.msk.f32.gmra.mrb[64].mxu1 %vm760_vm1, %v722_v52 }
 0x123   :  { %3263 = vmatprep.mubr.msk.f32.mxu1 %vm760_vm1, %v723_v31 }
 0x126   :  { %3264 = vmatmul.mubr.msk.f32.gmra.mrb[66].mxu1 %vm760_vm1, %v724_v60 }
 0x127   :  { %3266 = vmatprep.mubr.msk.f32.mxu1 %vm760_vm1, %v725_v61 }
 0x12a   :  { %3267 = vmatmul.mubr.msk.f32.gmra.mrb[68].mxu1 %vm760_vm1, %v726_v62 }
 0x12b   :  { %3269 = vmatprep.mubr.msk.f32.mxu1 %vm760_vm1, %v727_v1 }
 0x12e   :  { %3270 = vmatmul.mubr.msk.f32.gmra.mrb[70].mxu1 %vm760_vm1, %v728_v4 }
 0x12f   :  { %3272 = vmatprep.mubr.msk.f32.mxu1 %vm760_vm1, %v729_v6 }
 0x132   :  { %3273 = vmatmul.mubr.msk.f32.gmra.mrb[72].mxu1 %vm760_vm1, %v730_v7 }
 0x133   :  { %3275 = vmatprep.mubr.msk.f32.mxu1 %vm760_vm1, %v731_v9 }
 0x136   :  { %3276 = vmatmul.mubr.msk.f32.gmra.mrb[74].mxu1 %vm760_vm1, %v732_v11 }
 0x137   :  { %3278 = vmatprep.mubr.msk.f32.mxu1 %vm760_vm1, %v733_v12 }
 0x13a   :  { %3279 = vmatmul.mubr.msk.f32.gmra.mrb[76].mxu1 %vm760_vm1, %v734_v14 }
 0x13b   :  { %3281 = vmatprep.mubr.msk.f32.mxu1 %vm760_vm1, %v735_v18 }
 0x13e   :  { %3282 = vmatmul.mubr.msk.f32.gmra.mrb[78].mxu1 %vm760_vm1, %v736_v20 }
 0x13f   :  { %3284 = vmatprep.mubr.msk.f32.mxu1 %vm760_vm1, %v737_v21 }
 0x142   :  { %3285 = vmatmul.mubr.msk.f32.gmra.mrb[80].mxu1 %vm760_vm1, %v738_v22 }
 0x143   :  { %3287 = vmatprep.mubr.msk.f32.mxu1 %vm760_vm1, %v739_v23 }
 0x146   :  { %3288 = vmatmul.mubr.msk.f32.gmra.mrb[82].mxu1 %vm760_vm1, %v740_v26 }
 0x147   :  { %3290 = vmatprep.mubr.msk.f32.mxu1 %vm760_vm1, %v741_v29 }
 0x14a   :  { %3291 = vmatmul.mubr.msk.f32.gmra.mrb[84].mxu1 %vm760_vm1, %v742_v30 }
 0x14b   :  { %3293 = vmatprep.mubr.msk.f32.mxu1 %vm760_vm1, %v743_v32 }
 0x14e   :  { %3294 = vmatmul.mubr.msk.f32.gmra.mrb[86].mxu1 %vm760_vm1, %v744_v34 }
 0x14f   :  { %3296 = vmatprep.mubr.msk.f32.mxu1 %vm760_vm1, %v745_v36 }
 0x152   :  { %3297 = vmatmul.mubr.msk.f32.gmra.mrb[88].mxu1 %vm760_vm1, %v746_v38 }
 0x153   :  { %3299 = vmatprep.mubr.msk.f32.mxu1 %vm760_vm1, %v747_v41 }
 0x156   :  { %3300 = vmatmul.mubr.msk.f32.gmra.mrb[90].mxu1 %vm760_vm1, %v748_v43 }
 0x157   :  { %3302 = vmatprep.mubr.msk.f32.mxu1 %vm760_vm1, %v749_v46 }
 0x15a   :  { %3303 = vmatmul.mubr.msk.f32.gmra.mrb[92].mxu1 %vm760_vm1, %v750_v49 }
 0x15b   :  { %3305 = vmatprep.mubr.msk.f32.mxu1 %vm760_vm1, %v751_v33 }
 0x15e   :  { %3306 = vmatmul.mubr.msk.f32.gmra.mrb[94].mxu1 %vm760_vm1, %v752_v44 }
 0x1b5   :  { %v3214_v52 = vpop.f32.mrb[32].mxu1 }
 0x1b6   :  { %v1025_v53 = vadd.f32 %v3214_v52, %v4268_v39  ;;  %v1019_v54 = vpop.f32.mrb[33].mxu1 }
 0x1b7   :  { %v1020_v15 = vadd.f32 %v4268_v39, %v1019_v54 }
 0x1b8   :  { %v1339_v57 = vmax.f32 %v1025_v53, 0.0 }
 0x1b9   :  { %v1338_v51 = vmax.f32 %v1020_v15, 0.0  ;;  %v3217_v31 = vpop.f32.mrb[34].mxu1 }
 0x1ba   :  { %v1035_v60 = vadd.f32 %v3217_v31, %v4268_v39  ;;  %v1029_v42 = vpop.f32.mrb[35].mxu1 }
 0x1bb   :  { %v1030_v61 = vadd.f32 %v4268_v39, %v1029_v42  ;;  %3316 = vmatprep.mubr.msk.f32.mxu0 %vm1409_vm2, %v1338_v51 }
 0x1bc   :  { %3317 = vmatmul.mubr.msk.f32.vlgmr.msra.gmra.mrb[32].mxu0 %vm1409_vm2, %v1339_v57  ;;  %v1341_v63 = vmax.f32 %v1035_v60, 0.0 }
 0x1bd   :  { %v1340_v40 = vmax.f32 %v1030_v61, 0.0  ;;  %v3220_v62 = vpop.f32.mrb[36].mxu1 }
 0x1be   :  { %v1045_v1 = vadd.f32 %v3220_v62, %v4268_v39  ;;  %v1039_v50 = vpop.f32.mrb[37].mxu1 }
 0x1bf   :  { %v1040_v4 = vadd.f32 %v4268_v39, %v1039_v50  ;;  %3319 = vmatprep.mubr.msk.f32.mxu0 %vm1409_vm2, %v1340_v40 }
 0x1c0   :  { %v1343_v48 = vmax.f32 %v1045_v1, 0.0  ;;  %3320 = vmatmul.mubr.msk.f32.gmra.mrb[34].mxu0 %vm1409_vm2, %v1341_v63 }
 0x1c1   :  { %v1342_v6 = vmax.f32 %v1040_v4, 0.0  ;;  %v3223_v58 = vpop.f32.mrb[38].mxu1 }
 0x1c2   :  { %v1055_v7 = vadd.f32 %v3223_v58, %v4268_v39  ;;  %v1049_v56 = vpop.f32.mrb[39].mxu1 }
 0x1c3   :  { %v1050_v9 = vadd.f32 %v4268_v39, %v1049_v56  ;;  %3322 = vmatprep.mubr.msk.f32.mxu0 %vm1409_vm2, %v1342_v6 }
 0x1c4   :  { %v1345_v2 = vmax.f32 %v1055_v7, 0.0  ;;  %3323 = vmatmul.mubr.msk.f32.gmra.mrb[36].mxu0 %vm1409_vm2, %v1343_v48 }
 0x1c5   :  { %v1344_v11 = vmax.f32 %v1050_v9, 0.0  ;;  %v3226_v0 = vpop.f32.mrb[40].mxu1 }
 0x1c6   :  { %v1065_v12 = vadd.f32 %v3226_v0, %v4268_v39  ;;  %v1059_v10 = vpop.f32.mrb[41].mxu1 }
 0x1c7   :  { %v1060_v14 = vadd.f32 %v4268_v39, %v1059_v10  ;;  %3325 = vmatprep.mubr.msk.f32.mxu0 %vm1409_vm2, %v1344_v11 }
 0x1c8   :  { %v1347_v8 = vmax.f32 %v1065_v12, 0.0  ;;  %3326 = vmatmul.mubr.msk.f32.gmra.mrb[38].mxu0 %vm1409_vm2, %v1345_v2 }
 0x1c9   :  { %v1346_v18 = vmax.f32 %v1060_v14, 0.0  ;;  %v3229_v19 = vpop.f32.mrb[42].mxu1 }
 0x1ca   :  { %v1075_v20 = vadd.f32 %v3229_v19, %v4268_v39  ;;  %v1069_v17 = vpop.f32.mrb[43].mxu1 }
 0x1cb   :  { %v1070_v21 = vadd.f32 %v4268_v39, %v1069_v17  ;;  %3328 = vmatprep.mubr.msk.f32.mxu0 %vm1409_vm2, %v1346_v18 }
 0x1cc   :  { %v1349_v27 = vmax.f32 %v1075_v20, 0.0  ;;  %3329 = vmatmul.mubr.msk.f32.gmra.mrb[40].mxu0 %vm1409_vm2, %v1347_v8 }
 0x1cd   :  { %v1348_v22 = vmax.f32 %v1070_v21, 0.0  ;;  %v3232_v25 = vpop.f32.mrb[44].mxu1 }
 0x1ce   :  { %v1085_v23 = vadd.f32 %v3232_v25, %v4268_v39  ;;  %v1079_v37 = vpop.f32.mrb[45].mxu1 }
 0x1cf   :  { %v1080_v26 = vadd.f32 %v4268_v39, %v1079_v37  ;;  %3331 = vmatprep.mubr.msk.f32.mxu0 %vm1409_vm2, %v1348_v22 }
 0x1d0   :  { %v1351_v35 = vmax.f32 %v1085_v23, 0.0  ;;  %3332 = vmatmul.mubr.msk.f32.gmra.mrb[42].mxu0 %vm1409_vm2, %v1349_v27 }
 0x1d1   :  { %v1350_v29 = vmax.f32 %v1080_v26, 0.0  ;;  %v3235_v47 = vpop.f32.mrb[46].mxu1 }
 0x1d2   :  { %v1095_v30 = vadd.f32 %v3235_v47, %v4268_v39  ;;  %v1089_v45 = vpop.f32.mrb[47].mxu1 }
 0x1d3   :  { %v1090_v32 = vadd.f32 %v4268_v39, %v1089_v45  ;;  %3334 = vmatprep.mubr.msk.f32.mxu0 %vm1409_vm2, %v1350_v29 }
 0x1d4   :  { %v1353_v59 = vmax.f32 %v1095_v30, 0.0  ;;  %3335 = vmatmul.mubr.msk.f32.gmra.mrb[44].mxu0 %vm1409_vm2, %v1351_v35 }
 0x1d5   :  { %v1352_v34 = vmax.f32 %v1090_v32, 0.0  ;;  %v3238_v55 = vpop.f32.mrb[48].mxu1 }
 0x1d6   :  { %v1105_v36 = vadd.f32 %v3238_v55, %v4268_v39  ;;  %v1099_v5 = vpop.f32.mrb[49].mxu1 }
 0x1d7   :  { %v1100_v38 = vadd.f32 %v4268_v39, %v1099_v5  ;;  %3337 = vmatprep.mubr.msk.f32.mxu0 %vm1409_vm2, %v1352_v34 }
 0x1d8   :  { %v1355_v3 = vmax.f32 %v1105_v36, 0.0  ;;  %3338 = vmatmul.mubr.msk.f32.gmra.mrb[46].mxu0 %vm1409_vm2, %v1353_v59 }
 0x1d9   :  { %v1354_v41 = vmax.f32 %v1100_v38, 0.0  ;;  %v3241_v16 = vpop.f32.mrb[50].mxu1 }
 0x1da   :  { %v1115_v43 = vadd.f32 %v3241_v16, %v4268_v39  ;;  %v1109_v13 = vpop.f32.mrb[51].mxu1 }
 0x1db   :  { %v1110_v46 = vadd.f32 %v4268_v39, %v1109_v13  ;;  %3340 = vmatprep.mubr.msk.f32.mxu0 %vm1409_vm2, %v1354_v41 }
 0x1dc   :  { %v1357_v28 = vmax.f32 %v1115_v43, 0.0  ;;  %3341 = vmatmul.mubr.msk.f32.gmra.mrb[48].mxu0 %vm1409_vm2, %v1355_v3 }
 0x1dd   :  { %v1356_v49 = vmax.f32 %v1110_v46, 0.0  ;;  %v3244_v24 = vpop.f32.mrb[52].mxu1 }
 0x1de   :  { %v1125_v33 = vadd.f32 %v3244_v24, %v4268_v39  ;;  %v1119_v44 = vpop.f32.mrb[53].mxu1 }
 0x1df   :  { %v1120_v52 = vadd.f32 %v4268_v39, %v1119_v44  ;;  %3343 = vmatprep.mubr.msk.f32.mxu0 %vm1409_vm2, %v1356_v49 }
 0x1e0   :  { %v1359_v53 = vmax.f32 %v1125_v33, 0.0  ;;  %3344 = vmatmul.mubr.msk.f32.gmra.mrb[50].mxu0 %vm1409_vm2, %v1357_v28 }
 0x1e1   :  { %v1358_v54 = vmax.f32 %v1120_v52, 0.0  ;;  %v3247_v15 = vpop.f32.mrb[54].mxu1 }
 0x1e2   :  { %v1135_v51 = vadd.f32 %v3247_v15, %v4268_v39  ;;  %v1129_v31 = vpop.f32.mrb[55].mxu1 }
 0x1e3   :  { %v1130_v57 = vadd.f32 %v4268_v39, %v1129_v31  ;;  %3346 = vmatprep.mubr.msk.f32.mxu0 %vm1409_vm2, %v1358_v54 }
 0x1e4   :  { %v1361_v60 = vmax.f32 %v1135_v51, 0.0  ;;  %3347 = vmatmul.mubr.msk.f32.gmra.mrb[52].mxu0 %vm1409_vm2, %v1359_v53 }
 0x1e5   :  { %v1360_v42 = vmax.f32 %v1130_v57, 0.0  ;;  %v3250_v61 = vpop.f32.mrb[56].mxu1 }
 0x1e6   :  { %v1145_v40 = vadd.f32 %v3250_v61, %v4268_v39  ;;  %v1139_v62 = vpop.f32.mrb[57].mxu1 }
 0x1e7   :  { %v1140_v63 = vadd.f32 %v4268_v39, %v1139_v62  ;;  %3349 = vmatprep.mubr.msk.f32.mxu0 %vm1409_vm2, %v1360_v42 }
 0x1e8   :  { %v1363_v1 = vmax.f32 %v1145_v40, 0.0  ;;  %3350 = vmatmul.mubr.msk.f32.gmra.mrb[54].mxu0 %vm1409_vm2, %v1361_v60 }
 0x1e9   :  { %v1362_v50 = vmax.f32 %v1140_v63, 0.0  ;;  %v3253_v4 = vpop.f32.mrb[58].mxu1 }
 0x1ea   :  { %v1155_v48 = vadd.f32 %v3253_v4, %v4268_v39  ;;  %v1149_v6 = vpop.f32.mrb[59].mxu1 }
 0x1eb   :  { %v1150_v58 = vadd.f32 %v4268_v39, %v1149_v6  ;;  %3352 = vmatprep.mubr.msk.f32.mxu0 %vm1409_vm2, %v1362_v50 }
 0x1ec   :  { %v1365_v7 = vmax.f32 %v1155_v48, 0.0  ;;  %3353 = vmatmul.mubr.msk.f32.gmra.mrb[56].mxu0 %vm1409_vm2, %v1363_v1 }
 0x1ed   :  { %v1364_v56 = vmax.f32 %v1150_v58, 0.0  ;;  %v3256_v9 = vpop.f32.mrb[60].mxu1 }
 0x1ee   :  { %v1165_v2 = vadd.f32 %v3256_v9, %v4268_v39  ;;  %v1159_v11 = vpop.f32.mrb[61].mxu1 }
 0x1ef   :  { %v1160_v0 = vadd.f32 %v4268_v39, %v1159_v11  ;;  %3355 = vmatprep.mubr.msk.f32.mxu0 %vm1409_vm2, %v1364_v56 }
 0x1f0   :  { %v1367_v12 = vmax.f32 %v1165_v2, 0.0  ;;  %3356 = vmatmul.mubr.msk.f32.gmra.mrb[58].mxu0 %vm1409_vm2, %v1365_v7 }
 0x1f1   :  { %v1366_v10 = vmax.f32 %v1160_v0, 0.0  ;;  %v3259_v14 = vpop.f32.mrb[62].mxu1 }
 0x1f2   :  { %v1175_v8 = vadd.f32 %v3259_v14, %v4268_v39  ;;  %v1169_v18 = vpop.f32.mrb[63].mxu1 }
 0x1f3   :  { %v1170_v19 = vadd.f32 %v4268_v39, %v1169_v18  ;;  %3358 = vmatprep.mubr.msk.f32.mxu0 %vm1409_vm2, %v1366_v10 }
 0x1f4   :  { %v1369_v20 = vmax.f32 %v1175_v8, 0.0  ;;  %3359 = vmatmul.mubr.msk.f32.gmra.mrb[60].mxu0 %vm1409_vm2, %v1367_v12 }
 0x1f5   :  { %v1368_v17 = vmax.f32 %v1170_v19, 0.0  ;;  %v3262_v21 = vpop.f32.mrb[64].mxu1 }
 0x1f6   :  { %v1185_v27 = vadd.f32 %v3262_v21, %v4268_v39  ;;  %v1179_v22 = vpop.f32.mrb[65].mxu1 }
 0x1f7   :  { %v1180_v25 = vadd.f32 %v4268_v39, %v1179_v22  ;;  %3361 = vmatprep.mubr.msk.f32.mxu0 %vm1409_vm2, %v1368_v17 }
 0x1f8   :  { %v1371_v23 = vmax.f32 %v1185_v27, 0.0  ;;  %3362 = vmatmul.mubr.msk.f32.gmra.mrb[62].mxu0 %vm1409_vm2, %v1369_v20 }
 0x1f9   :  { %v1370_v37 = vmax.f32 %v1180_v25, 0.0  ;;  %v3265_v26 = vpop.f32.mrb[66].mxu1 }
 0x1fa   :  { %v1195_v35 = vadd.f32 %v3265_v26, %v4268_v39  ;;  %v1189_v29 = vpop.f32.mrb[67].mxu1 }
 0x1fb   :  { %v1190_v47 = vadd.f32 %v4268_v39, %v1189_v29  ;;  %3364 = vmatprep.mubr.msk.f32.mxu0 %vm1409_vm2, %v1370_v37 }
 0x1fc   :  { %v1373_v30 = vmax.f32 %v1195_v35, 0.0  ;;  %3365 = vmatmul.mubr.msk.f32.gmra.mrb[64].mxu0 %vm1409_vm2, %v1371_v23 }
 0x1fd   :  { %v1372_v45 = vmax.f32 %v1190_v47, 0.0  ;;  %v3268_v32 = vpop.f32.mrb[68].mxu1 }
 0x1fe   :  { %v1205_v59 = vadd.f32 %v3268_v32, %v4268_v39  ;;  %v1199_v34 = vpop.f32.mrb[69].mxu1 }
 0x1ff   :  { %v1200_v55 = vadd.f32 %v4268_v39, %v1199_v34  ;;  %3367 = vmatprep.mubr.msk.f32.mxu0 %vm1409_vm2, %v1372_v45 }
 0x200   :  { %v1375_v36 = vmax.f32 %v1205_v59, 0.0  ;;  %3368 = vmatmul.mubr.msk.f32.gmra.mrb[66].mxu0 %vm1409_vm2, %v1373_v30 }
 0x201   :  { %v1374_v5 = vmax.f32 %v1200_v55, 0.0  ;;  %v3271_v38 = vpop.f32.mrb[70].mxu1 }
 0x202   :  { %v1215_v3 = vadd.f32 %v3271_v38, %v4268_v39  ;;  %v1209_v41 = vpop.f32.mrb[71].mxu1 }
 0x203   :  { %v1210_v16 = vadd.f32 %v4268_v39, %v1209_v41  ;;  %3370 = vmatprep.mubr.msk.f32.mxu0 %vm1409_vm2, %v1374_v5 }
 0x204   :  { %v1377_v43 = vmax.f32 %v1215_v3, 0.0  ;;  %3371 = vmatmul.mubr.msk.f32.gmra.mrb[68].mxu0 %vm1409_vm2, %v1375_v36 }
 0x205   :  { %v1376_v13 = vmax.f32 %v1210_v16, 0.0  ;;  %v3274_v46 = vpop.f32.mrb[72].mxu1 }
 0x206   :  { %v1225_v28 = vadd.f32 %v3274_v46, %v4268_v39  ;;  %v1219_v49 = vpop.f32.mrb[73].mxu1 }
 0x207   :  { %v1220_v24 = vadd.f32 %v4268_v39, %v1219_v49  ;;  %3373 = vmatprep.mubr.msk.f32.mxu0 %vm1409_vm2, %v1376_v13 }
 0x208   :  { %v1379_v33 = vmax.f32 %v1225_v28, 0.0  ;;  %3374 = vmatmul.mubr.msk.f32.gmra.mrb[70].mxu0 %vm1409_vm2, %v1377_v43 }
 0x209   :  { %v1378_v44 = vmax.f32 %v1220_v24, 0.0  ;;  %v3277_v52 = vpop.f32.mrb[74].mxu1 }
 0x20a   :  { %v1235_v53 = vadd.f32 %v3277_v52, %v4268_v39  ;;  %v1229_v54 = vpop.f32.mrb[75].mxu1 }
 0x20b   :  { %v1230_v15 = vadd.f32 %v4268_v39, %v1229_v54  ;;  %3376 = vmatprep.mubr.msk.f32.mxu0 %vm1409_vm2, %v1378_v44 }
 0x20c   :  { %v1381_v51 = vmax.f32 %v1235_v53, 0.0  ;;  %3377 = vmatmul.mubr.msk.f32.gmra.mrb[72].mxu0 %vm1409_vm2, %v1379_v33 }
 0x20d   :  { %v1380_v31 = vmax.f32 %v1230_v15, 0.0  ;;  %v3280_v57 = vpop.f32.mrb[76].mxu1  ;;  %v4401_v15 = vld [vmem:[%s5177_s6] ss:$0 sm:$0xff] }
 0x20e   :  { %v1245_v60 = vadd.f32 %v3280_v57, %v4268_v39  ;;  %v1239_v42 = vpop.f32.mrb[77].mxu1 }
 0x20f   :  { %v1240_v61 = vadd.f32 %v4268_v39, %v1239_v42  ;;  %3379 = vmatprep.mubr.msk.f32.mxu0 %vm1409_vm2, %v1380_v31 }
 0x210   :  { %v1383_v40 = vmax.f32 %v1245_v60, 0.0  ;;  %3380 = vmatmul.mubr.msk.f32.gmra.mrb[74].mxu0 %vm1409_vm2, %v1381_v51 }
 0x211   :  { %v1382_v62 = vmax.f32 %v1240_v61, 0.0  ;;  %v3283_v63 = vpop.f32.mrb[78].mxu1 }
 0x212   :  { %v1255_v1 = vadd.f32 %v3283_v63, %v4268_v39  ;;  %v1249_v50 = vpop.f32.mrb[79].mxu1 }
 0x213   :  { %v1250_v4 = vadd.f32 %v4268_v39, %v1249_v50  ;;  %3382 = vmatprep.mubr.msk.f32.mxu0 %vm1409_vm2, %v1382_v62 }
 0x214   :  { %v1385_v48 = vmax.f32 %v1255_v1, 0.0  ;;  %3383 = vmatmul.mubr.msk.f32.gmra.mrb[76].mxu0 %vm1409_vm2, %v1383_v40 }
 0x215   :  { %v1384_v6 = vmax.f32 %v1250_v4, 0.0  ;;  %v3286_v58 = vpop.f32.mrb[80].mxu1 }
 0x216   :  { %v1265_v7 = vadd.f32 %v3286_v58, %v4268_v39  ;;  %v1259_v56 = vpop.f32.mrb[81].mxu1 }
 0x217   :  { %v1260_v9 = vadd.f32 %v4268_v39, %v1259_v56  ;;  %3385 = vmatprep.mubr.msk.f32.mxu0 %vm1409_vm2, %v1384_v6 }
 0x218   :  { %v1387_v2 = vmax.f32 %v1265_v7, 0.0  ;;  %3386 = vmatmul.mubr.msk.f32.gmra.mrb[78].mxu0 %vm1409_vm2, %v1385_v48 }
 0x219   :  { %v1386_v11 = vmax.f32 %v1260_v9, 0.0  ;;  %v3289_v0 = vpop.f32.mrb[82].mxu1 }
 0x21a   :  { %v1275_v12 = vadd.f32 %v3289_v0, %v4268_v39  ;;  %v1269_v10 = vpop.f32.mrb[83].mxu1 }
 0x21b   :  { %v1270_v14 = vadd.f32 %v4268_v39, %v1269_v10  ;;  %3388 = vmatprep.mubr.msk.f32.mxu0 %vm1409_vm2, %v1386_v11 }
 0x21c   :  { %v1389_v8 = vmax.f32 %v1275_v12, 0.0  ;;  %3389 = vmatmul.mubr.msk.f32.gmra.mrb[80].mxu0 %vm1409_vm2, %v1387_v2 }
 0x21d   :  { %v1388_v18 = vmax.f32 %v1270_v14, 0.0  ;;  %v3292_v19 = vpop.f32.mrb[84].mxu1 }
 0x21e   :  { %v1285_v20 = vadd.f32 %v3292_v19, %v4268_v39  ;;  %v1279_v17 = vpop.f32.mrb[85].mxu1 }
 0x21f   :  { %v1280_v21 = vadd.f32 %v4268_v39, %v1279_v17  ;;  %3391 = vmatprep.mubr.msk.f32.mxu0 %vm1409_vm2, %v1388_v18 }
 0x220   :  { %v1391_v27 = vmax.f32 %v1285_v20, 0.0  ;;  %3392 = vmatmul.mubr.msk.f32.gmra.mrb[82].mxu0 %vm1409_vm2, %v1389_v8 }
 0x221   :  { %v1390_v22 = vmax.f32 %v1280_v21, 0.0  ;;  %v3295_v25 = vpop.f32.mrb[86].mxu1 }
 0x222   :  { %v1295_v23 = vadd.f32 %v3295_v25, %v4268_v39  ;;  %v1289_v37 = vpop.f32.mrb[87].mxu1 }
 0x223   :  { %v1290_v26 = vadd.f32 %v4268_v39, %v1289_v37  ;;  %3394 = vmatprep.mubr.msk.f32.mxu0 %vm1409_vm2, %v1390_v22 }
 0x224   :  { %v1393_v35 = vmax.f32 %v1295_v23, 0.0  ;;  %3395 = vmatmul.mubr.msk.f32.gmra.mrb[84].mxu0 %vm1409_vm2, %v1391_v27 }
 0x225   :  { %v1392_v29 = vmax.f32 %v1290_v26, 0.0  ;;  %v3298_v47 = vpop.f32.mrb[88].mxu1 }
 0x226   :  { %v1305_v30 = vadd.f32 %v3298_v47, %v4268_v39  ;;  %v1299_v45 = vpop.f32.mrb[89].mxu1 }
 0x227   :  { %v1300_v32 = vadd.f32 %v4268_v39, %v1299_v45  ;;  %3397 = vmatprep.mubr.msk.f32.mxu0 %vm1409_vm2, %v1392_v29 }
 0x228   :  { %v1395_v59 = vmax.f32 %v1305_v30, 0.0  ;;  %3398 = vmatmul.mubr.msk.f32.gmra.mrb[86].mxu0 %vm1409_vm2, %v1393_v35 }
 0x229   :  { %v1394_v34 = vmax.f32 %v1300_v32, 0.0  ;;  %v3301_v55 = vpop.f32.mrb[90].mxu1 }
 0x22a   :  { %v1315_v36 = vadd.f32 %v3301_v55, %v4268_v39  ;;  %v1309_v5 = vpop.f32.mrb[91].mxu1 }
 0x22b   :  { %v1310_v38 = vadd.f32 %v4268_v39, %v1309_v5  ;;  %3400 = vmatprep.mubr.msk.f32.mxu0 %vm1409_vm2, %v1394_v34 }
 0x22c   :  { %v1397_v3 = vmax.f32 %v1315_v36, 0.0  ;;  %3401 = vmatmul.mubr.msk.f32.gmra.mrb[88].mxu0 %vm1409_vm2, %v1395_v59 }
 0x22d   :  { %v1396_v41 = vmax.f32 %v1310_v38, 0.0  ;;  %v3304_v16 = vpop.f32.mrb[92].mxu1 }
 0x22e   :  { %v1325_v43 = vadd.f32 %v3304_v16, %v4268_v39  ;;  %v1319_v13 = vpop.f32.mrb[93].mxu1 }
 0x22f   :  { %v1320_v46 = vadd.f32 %v4268_v39, %v1319_v13  ;;  %3403 = vmatprep.mubr.msk.f32.mxu0 %vm1409_vm2, %v1396_v41 }
 0x230   :  { %v1399_v28 = vmax.f32 %v1325_v43, 0.0  ;;  %3404 = vmatmul.mubr.msk.f32.gmra.mrb[90].mxu0 %vm1409_vm2, %v1397_v3 }
 0x231   :  { %v1398_v49 = vmax.f32 %v1320_v46, 0.0  ;;  %v3307_v24 = vpop.f32.mrb[94].mxu1 }
 0x232   :  { %v1335_v33 = vadd.f32 %v3307_v24, %v4268_v39  ;;  %v1329_v44 = vpop.f32.mrb[95].mxu1 }
 0x233   :  { %v1330_v52 = vadd.f32 %v4268_v39, %v1329_v44  ;;  %3406 = vmatprep.mubr.msk.f32.mxu0 %vm1409_vm2, %v1398_v49 }
 0x234   :  { %v1401_v53 = vmax.f32 %v1335_v33, 0.0  ;;  %3407 = vmatmul.mubr.msk.f32.gmra.mrb[92].mxu0 %vm1409_vm2, %v1399_v28 }
 0x235   :  { %v1400_v54 = vmax.f32 %v1330_v52, 0.0 }
 0x237   :  { %3409 = vmatprep.mubr.msk.f32.mxu0 %vm1409_vm2, %v1400_v54 }
 0x238   :  { %3410 = vmatmul.mubr.msk.f32.gmra.mrb[94].mxu0 %vm1409_vm2, %v1401_v53 }
 0x28f   :  { %v3318_v51 = vpop.f32.mrb[32].mxu0 }
 0x290   :  { %v4404_v31 = vadd.f32 %v3318_v51, %v4401_v15  ;;  %v1668_v39 = vpop.f32.mrb[33].mxu0 }
 0x291   :  { %v4408_v60 = vadd.f32 %v4401_v15, %v1668_v39 }
 0x292   :  { %1989 = vmax.xlane.f32.xlu0 %v4404_v31 }
 0x293   :  { %v3321_v57 = vpop.f32.mrb[34].mxu0 }
 0x294   :  { %v4411_v42 = vadd.f32 %v3321_v57, %v4401_v15  ;;  %v1678_v61 = vpop.f32.mrb[35].mxu0 }
 0x295   :  { %v4416_v62 = vadd.f32 %v4401_v15, %v1678_v61 }
 0x296   :  { %1993 = vmax.xlane.f32.xlu1 %v4411_v42  ;;  %1987 = vmax.xlane.f32.xlu0 %v4408_v60 }
 0x297   :  { %v3324_v40 = vpop.f32.mrb[36].mxu0 }
 0x298   :  { %v1688_v63 = vpop.f32.mrb[37].mxu0  ;;  %v4424_v4 = vadd.f32 %v3324_v40, %v4401_v15 }
 0x299   :  { %v4419_v1 = vadd.f32 %v4401_v15, %v1688_v63 }
 0x29a   :  { %1991 = vmax.xlane.f32.xlu1 %v4416_v62 }
 0x29b   :  { %v3327_v50 = vpop.f32.mrb[38].mxu0  ;;  %1995 = vmax.xlane.f32.xlu0 %v4419_v1 }
 0x29c   :  { %v1698_v48 = vpop.f32.mrb[39].mxu0  ;;  %v4432_v7 = vadd.f32 %v3327_v50, %v4401_v15 }
 0x29d   :  { %v4427_v6 = vadd.f32 %v4401_v15, %v1698_v48 }
 0x29e   :  { %1997 = vmax.xlane.f32.xlu1 %v4424_v4 }
 0x29f   :  { %v3330_v58 = vpop.f32.mrb[40].mxu0  ;;  %1999 = vmax.xlane.f32.xlu0 %v4427_v6 }
 0x2a0   :  { %v1708_v56 = vpop.f32.mrb[41].mxu0  ;;  %v4440_v11 = vadd.f32 %v3330_v58, %v4401_v15 }
 0x2a1   :  { %v4435_v9 = vadd.f32 %v4401_v15, %v1708_v56 }
 0x2a2   :  { %2001 = vmax.xlane.f32.xlu1 %v4432_v7 }
 0x2a3   :  { %v3333_v2 = vpop.f32.mrb[42].mxu0  ;;  %2003 = vmax.xlane.f32.xlu0 %v4435_v9 }
 0x2a4   :  { %v1718_v0 = vpop.f32.mrb[43].mxu0  ;;  %v4448_v14 = vadd.f32 %v3333_v2, %v4401_v15 }
 0x2a5   :  { %v4443_v12 = vadd.f32 %v4401_v15, %v1718_v0 }
 0x2a6   :  { %2005 = vmax.xlane.f32.xlu1 %v4440_v11 }
 0x2a7   :  { %v3336_v10 = vpop.f32.mrb[44].mxu0  ;;  %2007 = vmax.xlane.f32.xlu0 %v4443_v12 }
 0x2a8   :  { %v1728_v8 = vpop.f32.mrb[45].mxu0  ;;  %v4456_v20 = vadd.f32 %v3336_v10, %v4401_v15 }
 0x2a9   :  { %v4451_v18 = vadd.f32 %v4401_v15, %v1728_v8 }
 0x2aa   :  { %2009 = vmax.xlane.f32.xlu1 %v4448_v14 }
 0x2ab   :  { %v3339_v19 = vpop.f32.mrb[46].mxu0  ;;  %2011 = vmax.xlane.f32.xlu0 %v4451_v18 }
 0x2ac   :  { %v1738_v17 = vpop.f32.mrb[47].mxu0  ;;  %v4464_v22 = vadd.f32 %v3339_v19, %v4401_v15 }
 0x2ad   :  { %v4459_v21 = vadd.f32 %v4401_v15, %v1738_v17 }
 0x2ae   :  { %2013 = vmax.xlane.f32.xlu1 %v4456_v20 }
 0x2af   :  { %v3342_v27 = vpop.f32.mrb[48].mxu0  ;;  %2015 = vmax.xlane.f32.xlu0 %v4459_v21 }
 0x2b0   :  { %v1748_v25 = vpop.f32.mrb[49].mxu0  ;;  %v4472_v26 = vadd.f32 %v3342_v27, %v4401_v15 }
 0x2b1   :  { %v4467_v23 = vadd.f32 %v4401_v15, %v1748_v25 }
 0x2b2   :  { %2017 = vmax.xlane.f32.xlu1 %v4464_v22 }
 0x2b3   :  { %v3345_v37 = vpop.f32.mrb[50].mxu0  ;;  %2019 = vmax.xlane.f32.xlu0 %v4467_v23 }
 0x2b4   :  { %v1758_v35 = vpop.f32.mrb[51].mxu0  ;;  %v4480_v30 = vadd.f32 %v3345_v37, %v4401_v15 }
 0x2b5   :  { %v4475_v29 = vadd.f32 %v4401_v15, %v1758_v35 }
 0x2b6   :  { %2021 = vmax.xlane.f32.xlu1 %v4472_v26 }
 0x2b7   :  { %v3348_v47 = vpop.f32.mrb[52].mxu0  ;;  %2023 = vmax.xlane.f32.xlu0 %v4475_v29 }
 0x2b8   :  { %v1768_v45 = vpop.f32.mrb[53].mxu0  ;;  %v4488_v34 = vadd.f32 %v3348_v47, %v4401_v15 }
 0x2b9   :  { %v4483_v32 = vadd.f32 %v4401_v15, %v1768_v45 }
 0x2ba   :  { %2025 = vmax.xlane.f32.xlu1 %v4480_v30 }
 0x2bb   :  { %v3351_v59 = vpop.f32.mrb[54].mxu0  ;;  %2027 = vmax.xlane.f32.xlu0 %v4483_v32 }
 0x2bc   :  { %v1778_v55 = vpop.f32.mrb[55].mxu0  ;;  %v4496_v38 = vadd.f32 %v3351_v59, %v4401_v15 }
 0x2bd   :  { %v4491_v36 = vadd.f32 %v4401_v15, %v1778_v55 }
 0x2be   :  { %2029 = vmax.xlane.f32.xlu1 %v4488_v34 }
 0x2bf   :  { %v3354_v5 = vpop.f32.mrb[56].mxu0  ;;  %2031 = vmax.xlane.f32.xlu0 %v4491_v36 }
 0x2c0   :  { %v1788_v3 = vpop.f32.mrb[57].mxu0  ;;  %v4504_v43 = vadd.f32 %v3354_v5, %v4401_v15 }
 0x2c1   :  { %v4499_v41 = vadd.f32 %v4401_v15, %v1788_v3 }
 0x2c2   :  { %2033 = vmax.xlane.f32.xlu1 %v4496_v38 }
 0x2c3   :  { %v3357_v16 = vpop.f32.mrb[58].mxu0  ;;  %2035 = vmax.xlane.f32.xlu0 %v4499_v41 }
 0x2c4   :  { %v1798_v13 = vpop.f32.mrb[59].mxu0  ;;  %v4512_v49 = vadd.f32 %v3357_v16, %v4401_v15 }
 0x2c5   :  { %v4507_v46 = vadd.f32 %v4401_v15, %v1798_v13 }
 0x2c6   :  { %2037 = vmax.xlane.f32.xlu1 %v4504_v43 }
 0x2c7   :  { %v3360_v28 = vpop.f32.mrb[60].mxu0  ;;  %2039 = vmax.xlane.f32.xlu0 %v4507_v46 }
 0x2c8   :  { %v1808_v24 = vpop.f32.mrb[61].mxu0  ;;  %v4520_v52 = vadd.f32 %v3360_v28, %v4401_v15 }
 0x2c9   :  { %v4515_v33 = vadd.f32 %v4401_v15, %v1808_v24 }
 0x2ca   :  { %2041 = vmax.xlane.f32.xlu1 %v4512_v49 }
 0x2cb   :  { %v3363_v44 = vpop.f32.mrb[62].mxu0  ;;  %2043 = vmax.xlane.f32.xlu0 %v4515_v33 }
 0x2cc   :  { %v1818_v53 = vpop.f32.mrb[63].mxu0  ;;  %v4528_v39 = vadd.f32 %v3363_v44, %v4401_v15 }
 0x2cd   :  { %v4523_v54 = vadd.f32 %v4401_v15, %v1818_v53 }
 0x2ce   :  { %2045 = vmax.xlane.f32.xlu1 %v4520_v52 }
 0x2cf   :  { %v3366_v51 = vpop.f32.mrb[64].mxu0  ;;  %2047 = vmax.xlane.f32.xlu0 %v4523_v54 }
 0x2d0   :  { %v1828_v57 = vpop.f32.mrb[65].mxu0  ;;  %v4536_v63 = vadd.f32 %v3366_v51, %v4401_v15 }
 0x2d1   :  { %v4531_v61 = vadd.f32 %v4401_v15, %v1828_v57 }
 0x2d2   :  { %2049 = vmax.xlane.f32.xlu1 %v4528_v39 }
 0x2d3   :  { %v3369_v40 = vpop.f32.mrb[66].mxu0  ;;  %2051 = vmax.xlane.f32.xlu0 %v4531_v61 }
 0x2d4   :  { %v1838_v50 = vpop.f32.mrb[67].mxu0  ;;  %v4544_v56 = vadd.f32 %v3369_v40, %v4401_v15 }
 0x2d5   :  { %v4539_v48 = vadd.f32 %v4401_v15, %v1838_v50 }
 0x2d6   :  { %2053 = vmax.xlane.f32.xlu1 %v4536_v63 }
 0x2d7   :  { %v3372_v58 = vpop.f32.mrb[68].mxu0  ;;  %2055 = vmax.xlane.f32.xlu0 %v4539_v48 }
 0x2d8   :  { %v1848_v2 = vpop.f32.mrb[69].mxu0  ;;  %v4552_v8 = vadd.f32 %v3372_v58, %v4401_v15 }
 0x2d9   :  { %v4547_v0 = vadd.f32 %v4401_v15, %v1848_v2 }
 0x2da   :  { %2057 = vmax.xlane.f32.xlu1 %v4544_v56 }
 0x2db   :  { %v3375_v10 = vpop.f32.mrb[70].mxu0  ;;  %2059 = vmax.xlane.f32.xlu0 %v4547_v0 }
 0x2dc   :  { %v1858_v19 = vpop.f32.mrb[71].mxu0  ;;  %v4560_v25 = vadd.f32 %v3375_v10, %v4401_v15 }
 0x2dd   :  { %v4555_v17 = vadd.f32 %v4401_v15, %v1858_v19 }
 0x2de   :  { %2061 = vmax.xlane.f32.xlu1 %v4552_v8 }
 0x2df   :  { %v3378_v27 = vpop.f32.mrb[72].mxu0  ;;  %2063 = vmax.xlane.f32.xlu0 %v4555_v17 }
 0x2e0   :  { %v1868_v37 = vpop.f32.mrb[73].mxu0  ;;  %v4568_v45 = vadd.f32 %v3378_v27, %v4401_v15 }
 0x2e1   :  { %v4563_v35 = vadd.f32 %v4401_v15, %v1868_v37 }
 0x2e2   :  { %2065 = vmax.xlane.f32.xlu1 %v4560_v25 }
 0x2e3   :  { %v3381_v47 = vpop.f32.mrb[74].mxu0  ;;  %2067 = vmax.xlane.f32.xlu0 %v4563_v35 }
 0x2e4   :  { %v1878_v59 = vpop.f32.mrb[75].mxu0  ;;  %v4576_v3 = vadd.f32 %v3381_v47, %v4401_v15 }
 0x2e5   :  { %v4571_v55 = vadd.f32 %v4401_v15, %v1878_v59 }
 0x2e6   :  { %2069 = vmax.xlane.f32.xlu1 %v4568_v45 }
 0x2e7   :  { %v3384_v5 = vpop.f32.mrb[76].mxu0  ;;  %2071 = vmax.xlane.f32.xlu0 %v4571_v55 }
 0x2e8   :  { %v1888_v16 = vpop.f32.mrb[77].mxu0  ;;  %v4584_v24 = vadd.f32 %v3384_v5, %v4401_v15 }
 0x2e9   :  { %v4579_v13 = vadd.f32 %v4401_v15, %v1888_v16 }
 0x2ea   :  { %2073 = vmax.xlane.f32.xlu1 %v4576_v3 }
 0x2eb   :  { %v3387_v28 = vpop.f32.mrb[78].mxu0  ;;  %2075 = vmax.xlane.f32.xlu0 %v4579_v13 }
 0x2ec   :  { %v1898_v44 = vpop.f32.mrb[79].mxu0  ;;  %v4592_v57 = vadd.f32 %v3387_v28, %v4401_v15 }
 0x2ed   :  { %v4587_v53 = vadd.f32 %v4401_v15, %v1898_v44 }
 0x2ee   :  { %2077 = vmax.xlane.f32.xlu1 %v4584_v24 }
 0x2ef   :  { %v3390_v51 = vpop.f32.mrb[80].mxu0  ;;  %2079 = vmax.xlane.f32.xlu0 %v4587_v53 }
 0x2f0   :  { %v1908_v40 = vpop.f32.mrb[81].mxu0  ;;  %v4600_v2 = vadd.f32 %v3390_v51, %v4401_v15 }
 0x2f1   :  { %v4595_v50 = vadd.f32 %v4401_v15, %v1908_v40 }
 0x2f2   :  { %2081 = vmax.xlane.f32.xlu1 %v4592_v57 }
 0x2f3   :  { %v3393_v58 = vpop.f32.mrb[82].mxu0  ;;  %2083 = vmax.xlane.f32.xlu0 %v4595_v50 }
 0x2f4   :  { %v1918_v10 = vpop.f32.mrb[83].mxu0  ;;  %v4608_v37 = vadd.f32 %v3393_v58, %v4401_v15 }
 0x2f5   :  { %v4603_v19 = vadd.f32 %v4401_v15, %v1918_v10 }
 0x2f6   :  { %2085 = vmax.xlane.f32.xlu1 %v4600_v2 }
 0x2f7   :  { %v3396_v27 = vpop.f32.mrb[84].mxu0  ;;  %2087 = vmax.xlane.f32.xlu0 %v4603_v19 }
 0x2f8   :  { %v1928_v47 = vpop.f32.mrb[85].mxu0  ;;  %v4616_v16 = vadd.f32 %v3396_v27, %v4401_v15 }
 0x2f9   :  { %v4611_v59 = vadd.f32 %v4401_v15, %v1928_v47 }
 0x2fa   :  { %2089 = vmax.xlane.f32.xlu1 %v4608_v37  ;;  %5203 = vst [vmem:[#allocation2_spill] sm:$0xff] %v4616_v16 }
 0x2fb   :  { %v3399_v5 = vpop.f32.mrb[86].mxu0  ;;  %2091 = vmax.xlane.f32.xlu0 %v4611_v59 }
 0x2fc   :  { %v1938_v28 = vpop.f32.mrb[87].mxu0  ;;  %v4624_v40 = vadd.f32 %v3399_v5, %v4401_v15 }
 0x2fd   :  { %v4619_v44 = vadd.f32 %v4401_v15, %v1938_v28 }
 0x2fe   :  { %2093 = vmax.xlane.f32.xlu1 %v4616_v16  ;;  %5205 = vst [vmem:[#allocation4_spill] sm:$0xff] %v4624_v40 }
 0x2ff   :  { %5204 = vst [vmem:[#allocation3_spill] sm:$0xff] %v4619_v44  ;;  %v3402_v51 = vpop.f32.mrb[88].mxu0  ;;  %2095 = vmax.xlane.f32.xlu0 %v4619_v44 }
 0x300   :  { %v1948_v58 = vpop.f32.mrb[89].mxu0  ;;  %v4632_v47 = vadd.f32 %v3402_v51, %v4401_v15 }
 0x301   :  { %v4627_v10 = vadd.f32 %v4401_v15, %v1948_v58 }
 0x302   :  { %2097 = vmax.xlane.f32.xlu1 %v4624_v40  ;;  %5207 = vst [vmem:[#allocation6_spill] sm:$0xff] %v4632_v47 }
 0x303   :  { %5206 = vst [vmem:[#allocation5_spill] sm:$0xff] %v4627_v10  ;;  %v3405_v27 = vpop.f32.mrb[90].mxu0  ;;  %2099 = vmax.xlane.f32.xlu0 %v4627_v10 }
 0x304   :  { %v1958_v28 = vpop.f32.mrb[91].mxu0  ;;  %v4640_v58 = vadd.f32 %v3405_v27, %v4401_v15 }
 0x305   :  { %v4635_v16 = vadd.f32 %v4401_v15, %v1958_v28 }
 0x306   :  { %2101 = vmax.xlane.f32.xlu1 %v4632_v47  ;;  %5209 = vst [vmem:[#allocation8_spill] sm:$0xff] %v4640_v58 }
 0x307   :  { %5208 = vst [vmem:[#allocation7_spill] sm:$0xff] %v4635_v16  ;;  %v3408_v5 = vpop.f32.mrb[92].mxu0  ;;  %2103 = vmax.xlane.f32.xlu0 %v4635_v16 }
 0x308   :  { %v1968_v44 = vpop.f32.mrb[93].mxu0  ;;  %v4648_v28 = vadd.f32 %v3408_v5, %v4401_v15 }
 0x309   :  { %v4643_v40 = vadd.f32 %v4401_v15, %v1968_v44 }
 0x30a   :  { %2105 = vmax.xlane.f32.xlu1 %v4640_v58  ;;  %5211 = vst [vmem:[#allocation10_spill] sm:$0xff] %v4648_v28 }
 0x30b   :  { %5210 = vst [vmem:[#allocation9_spill] sm:$0xff] %v4643_v40  ;;  %v3411_v51 = vpop.f32.mrb[94].mxu0  ;;  %2107 = vmax.xlane.f32.xlu0 %v4643_v40 }
 0x30c   :  { %v1978_v10 = vpop.f32.mrb[95].mxu0  ;;  %v4656_v27 = vadd.f32 %v3411_v51, %v4401_v15 }
 0x30d   :  { %v4651_v47 = vadd.f32 %v4401_v15, %v1978_v10 }
 0x30e   :  { %2109 = vmax.xlane.f32.xlu1 %v4648_v28  ;;  %5212 = vst [vmem:[#allocation11_spill] sm:$0xff] %v4656_v27 }
 0x30f   :  { %2111 = vmax.xlane.f32.xlu0 %v4651_v47 }
 0x312   :  { %2113 = vmax.xlane.f32.xlu1 %v4656_v27 }
 0x31f   :  { %v1990_v44 = vpop.xlane.xlu0 %1989 }
 0x320   :  { %v4660_v58 = vsub.f32 %v4404_v31, %v1990_v44 }
 0x322   :  { %5213 = vst [vmem:[#allocation12_spill] sm:$0xff] %v4660_v58  ;;  %v2181_v5 = vmul.f32 1.442695, %v4660_v58 }
 0x323   :  { %v1994_v40 = vpop.xlane.xlu1 %1993  ;;  %v1988_v16 = vpop.xlane.xlu0 %1987 }
 0x324   :  { %3442 = vpow2.f32 %v2181_v5  ;;  %v4664_v10 = vsub.f32 %v4411_v42, %v1994_v40  ;;  %v4667_v28 = vsub.f32 %v4408_v60, %v1988_v16 }
 0x326   :  { %v2185_v15 = vmul.f32 1.442695, %v4664_v10  ;;  %v2179_v51 = vmul.f32 1.442695, %v4667_v28 }
 0x327   :  { %v1992_v27 = vpop.xlane.xlu1 %1991 }
 0x328   :  { %3444 = vpow2.f32 %v2185_v15  ;;  %v4672_v31 = vsub.f32 %v4416_v62, %v1992_v27  ;;  %v1996_v44 = vpop.xlane.xlu0 %1995 }
 0x329   :  { %3446 = vpow2.f32 %v2179_v51  ;;  %v4675_v58 = vsub.f32 %v4419_v1, %v1996_v44 }
 0x32a   :  { %v2183_v42 = vmul.f32 1.442695, %v4672_v31 }
 0x32b   :  { %5214 = vst [vmem:[#allocation13_spill] sm:$0xff] %v4675_v58  ;;  %v1998_v40 = vpop.xlane.xlu1 %1997  ;;  %v2187_v5 = vmul.f32 1.442695, %v4675_v58 }
 0x32c   :  { %3448 = vpow2.f32 %v2183_v42  ;;  %v4679_v60 = vsub.f32 %v4424_v4, %v1998_v40  ;;  %v2000_v16 = vpop.xlane.xlu0 %1999 }
 0x32d   :  { %v4683_v15 = vsub.f32 %v4427_v6, %v2000_v16 }
 0x32e   :  { %v3443_v62 = vpop.eup %3442  ;;  %v2189_v27 = vmul.f32 1.442695, %v4679_v60 }
 0x32f   :  { %2309 = vadd.xlane.f32.xlu1 %v3443_v62  ;;  %v2002_v51 = vpop.xlane.xlu1 %2001  ;;  %v2191_v4 = vmul.f32 1.442695, %v4683_v15 }
 0x330   :  { %3450 = vpow2.f32 %v2189_v27  ;;  %v4687_v1 = vsub.f32 %v4432_v7, %v2002_v51  ;;  %v2004_v44 = vpop.xlane.xlu0 %2003 }
 0x331   :  { %3452 = vpow2.f32 %v2187_v5  ;;  %v4691_v42 = vsub.f32 %v4435_v9, %v2004_v44 }
 0x332   :  { %v3445_v40 = vpop.eup %3444  ;;  %v2193_v6 = vmul.f32 1.442695, %v4687_v1 }
 0x333   :  { %v3447_v16 = vpop.eup %3446  ;;  %2313 = vadd.xlane.f32.xlu1 %v3445_v40  ;;  %v2006_v58 = vpop.xlane.xlu1 %2005  ;;  %v2195_v5 = vmul.f32 1.442695, %v4691_v42 }
 0x334   :  { %3454 = vpow2.f32 %v2193_v6  ;;  %v4695_v62 = vsub.f32 %v4440_v11, %v2006_v58  ;;  %2307 = vadd.xlane.f32.xlu0 %v3447_v16  ;;  %v2008_v7 = vpop.xlane.xlu0 %2007 }
 0x335   :  { %3456 = vpow2.f32 %v2191_v4  ;;  %v4699_v27 = vsub.f32 %v4443_v12, %v2008_v7 }
 0x336   :  { %v3449_v9 = vpop.eup %3448  ;;  %v2197_v51 = vmul.f32 1.442695, %v4695_v62 }
 0x337   :  { %5215 = vst [vmem:[#allocation14_spill] sm:$0xff] %v4699_v27  ;;  %v2010_v44 = vpop.xlane.xlu1 %2009  ;;  %v2199_v11 = vmul.f32 1.442695, %v4699_v27 }
 0x338   :  { %3458 = vpow2.f32 %v2197_v51  ;;  %v4703_v40 = vsub.f32 %v4448_v14, %v2010_v44  ;;  %2311 = vadd.xlane.f32.xlu0 %v3449_v9  ;;  %v2012_v6 = vpop.xlane.xlu0 %2011 }
 0x339   :  { %3460 = vpow2.f32 %v2195_v5  ;;  %v4707_v58 = vsub.f32 %v4451_v18, %v2012_v6 }
 0x33a   :  { %v3451_v4 = vpop.eup %3450  ;;  %v2201_v12 = vmul.f32 1.442695, %v4703_v40 }
 0x33b   :  { %v3453_v16 = vpop.eup %3452  ;;  %2317 = vadd.xlane.f32.xlu1 %v3451_v4  ;;  %v2014_v7 = vpop.xlane.xlu1 %2013  ;;  %v2203_v5 = vmul.f32 1.442695, %v4707_v58 }
 0x33c   :  { %3462 = vpow2.f32 %v2201_v12  ;;  %v4711_v51 = vsub.f32 %v4456_v20, %v2014_v7  ;;  %2315 = vadd.xlane.f32.xlu0 %v3453_v16  ;;  %v2016_v14 = vpop.xlane.xlu0 %2015 }
 0x33d   :  { %3464 = vpow2.f32 %v2199_v11  ;;  %v4715_v9 = vsub.f32 %v4459_v21, %v2016_v14 }
 0x33e   :  { %v3455_v18 = vpop.eup %3454  ;;  %v2205_v44 = vmul.f32 1.442695, %v4711_v51 }
 0x33f   :  { %v3457_v6 = vpop.eup %3456  ;;  %2321 = vadd.xlane.f32.xlu1 %v3455_v18  ;;  %v2018_v27 = vpop.xlane.xlu1 %2017  ;;  %v2207_v11 = vmul.f32 1.442695, %v4715_v9 }
 0x340   :  { %3466 = vpow2.f32 %v2205_v44  ;;  %v4719_v4 = vsub.f32 %v4464_v22, %v2018_v27  ;;  %2319 = vadd.xlane.f32.xlu0 %v3457_v6  ;;  %v2020_v20 = vpop.xlane.xlu0 %2019 }
 0x341   :  { %3468 = vpow2.f32 %v2203_v5  ;;  %v4723_v12 = vsub.f32 %v4467_v23, %v2020_v20 }
 0x342   :  { %v3459_v21 = vpop.eup %3458  ;;  %v2209_v16 = vmul.f32 1.442695, %v4719_v4 }
 0x343   :  { %v3461_v7 = vpop.eup %3460  ;;  %2325 = vadd.xlane.f32.xlu1 %v3459_v21  ;;  %v2022_v14 = vpop.xlane.xlu1 %2021  ;;  %v2211_v27 = vmul.f32 1.442695, %v4723_v12 }
 0x344   :  { %3470 = vpow2.f32 %v2209_v16  ;;  %v4727_v18 = vsub.f32 %v4472_v26, %v2022_v14  ;;  %2323 = vadd.xlane.f32.xlu0 %v3461_v7  ;;  %v2024_v22 = vpop.xlane.xlu0 %2023 }
 0x345   :  { %3472 = vpow2.f32 %v2207_v11  ;;  %v4731_v5 = vsub.f32 %v4475_v29, %v2024_v22 }
 0x346   :  { %v3463_v23 = vpop.eup %3462  ;;  %v2213_v44 = vmul.f32 1.442695, %v4727_v18 }
 0x347   :  { %v3465_v6 = vpop.eup %3464  ;;  %2329 = vadd.xlane.f32.xlu1 %v3463_v23  ;;  %v2026_v20 = vpop.xlane.xlu1 %2025  ;;  %v2215_v11 = vmul.f32 1.442695, %v4731_v5 }
 0x348   :  { %3474 = vpow2.f32 %v2213_v44  ;;  %v4735_v21 = vsub.f32 %v4480_v30, %v2026_v20  ;;  %2327 = vadd.xlane.f32.xlu0 %v3465_v6  ;;  %v2028_v26 = vpop.xlane.xlu0 %2027 }
 0x349   :  { %3476 = vpow2.f32 %v2211_v27  ;;  %v4739_v16 = vsub.f32 %v4483_v32, %v2028_v26 }
 0x34a   :  { %v3467_v29 = vpop.eup %3466  ;;  %v2217_v7 = vmul.f32 1.442695, %v4735_v21 }
 0x34b   :  { %v3469_v14 = vpop.eup %3468  ;;  %2333 = vadd.xlane.f32.xlu1 %v3467_v29  ;;  %v2030_v22 = vpop.xlane.xlu1 %2029  ;;  %v2219_v27 = vmul.f32 1.442695, %v4739_v16 }
 0x34c   :  { %3478 = vpow2.f32 %v2217_v7  ;;  %v4743_v23 = vsub.f32 %v4488_v34, %v2030_v22  ;;  %2331 = vadd.xlane.f32.xlu0 %v3469_v14  ;;  %v2032_v30 = vpop.xlane.xlu0 %2031 }
 0x34d   :  { %3480 = vpow2.f32 %v2215_v11  ;;  %v4747_v44 = vsub.f32 %v4491_v36, %v2032_v30 }
 0x34e   :  { %v3471_v32 = vpop.eup %3470  ;;  %v2221_v6 = vmul.f32 1.442695, %v4743_v23 }
 0x34f   :  { %v3473_v20 = vpop.eup %3472  ;;  %2337 = vadd.xlane.f32.xlu1 %v3471_v32  ;;  %v2034_v26 = vpop.xlane.xlu1 %2033  ;;  %v2223_v11 = vmul.f32 1.442695, %v4747_v44 }
 0x350   :  { %3482 = vpow2.f32 %v2221_v6  ;;  %v4751_v29 = vsub.f32 %v4496_v38, %v2034_v26  ;;  %2335 = vadd.xlane.f32.xlu0 %v3473_v20  ;;  %v2036_v34 = vpop.xlane.xlu0 %2035 }
 0x351   :  { %3484 = vpow2.f32 %v2219_v27  ;;  %v4755_v7 = vsub.f32 %v4499_v41, %v2036_v34 }
 0x352   :  { %v3475_v36 = vpop.eup %3474  ;;  %v2225_v14 = vmul.f32 1.442695, %v4751_v29 }
 0x353   :  { %v3477_v22 = vpop.eup %3476  ;;  %2341 = vadd.xlane.f32.xlu1 %v3475_v36  ;;  %v2038_v30 = vpop.xlane.xlu1 %2037  ;;  %v2227_v27 = vmul.f32 1.442695, %v4755_v7 }
 0x354   :  { %3486 = vpow2.f32 %v2225_v14  ;;  %v4759_v32 = vsub.f32 %v4504_v43, %v2038_v30  ;;  %2339 = vadd.xlane.f32.xlu0 %v3477_v22  ;;  %v2040_v38 = vpop.xlane.xlu0 %2039 }
 0x355   :  { %3488 = vpow2.f32 %v2223_v11  ;;  %v4763_v6 = vsub.f32 %v4507_v46, %v2040_v38 }
 0x356   :  { %v3479_v41 = vpop.eup %3478  ;;  %v2229_v20 = vmul.f32 1.442695, %v4759_v32 }
 0x357   :  { %v3481_v26 = vpop.eup %3480  ;;  %2345 = vadd.xlane.f32.xlu1 %v3479_v41  ;;  %v2042_v34 = vpop.xlane.xlu1 %2041  ;;  %v2231_v11 = vmul.f32 1.442695, %v4763_v6 }
 0x358   :  { %3490 = vpow2.f32 %v2229_v20  ;;  %v4767_v36 = vsub.f32 %v4512_v49, %v2042_v34  ;;  %2343 = vadd.xlane.f32.xlu0 %v3481_v26  ;;  %v2044_v43 = vpop.xlane.xlu0 %2043 }
 0x359   :  { %3492 = vpow2.f32 %v2227_v27  ;;  %v4771_v14 = vsub.f32 %v4515_v33, %v2044_v43 }
 0x35a   :  { %v3483_v46 = vpop.eup %3482  ;;  %v2233_v22 = vmul.f32 1.442695, %v4767_v36 }
 0x35b   :  { %v3485_v30 = vpop.eup %3484  ;;  %2349 = vadd.xlane.f32.xlu1 %v3483_v46  ;;  %v2046_v38 = vpop.xlane.xlu1 %2045  ;;  %v2235_v27 = vmul.f32 1.442695, %v4771_v14 }
 0x35c   :  { %3494 = vpow2.f32 %v2233_v22  ;;  %v4775_v41 = vsub.f32 %v4520_v52, %v2046_v38  ;;  %2347 = vadd.xlane.f32.xlu0 %v3485_v30  ;;  %v2048_v49 = vpop.xlane.xlu0 %2047 }
 0x35d   :  { %3496 = vpow2.f32 %v2231_v11  ;;  %v4779_v20 = vsub.f32 %v4523_v54, %v2048_v49 }
 0x35e   :  { %v3487_v33 = vpop.eup %3486  ;;  %v2237_v26 = vmul.f32 1.442695, %v4775_v41 }
 0x35f   :  { %v3489_v34 = vpop.eup %3488  ;;  %2353 = vadd.xlane.f32.xlu1 %v3487_v33  ;;  %v2050_v43 = vpop.xlane.xlu1 %2049  ;;  %v2239_v11 = vmul.f32 1.442695, %v4779_v20 }
 0x360   :  { %3498 = vpow2.f32 %v2237_v26  ;;  %v4783_v46 = vsub.f32 %v4528_v39, %v2050_v43  ;;  %2351 = vadd.xlane.f32.xlu0 %v3489_v34  ;;  %v2052_v52 = vpop.xlane.xlu0 %2051 }
 0x361   :  { %3500 = vpow2.f32 %v2235_v27  ;;  %v4787_v22 = vsub.f32 %v4531_v61, %v2052_v52 }
 0x362   :  { %v3491_v54 = vpop.eup %3490  ;;  %v2241_v30 = vmul.f32 1.442695, %v4783_v46 }
 0x363   :  { %v3493_v38 = vpop.eup %3492  ;;  %2357 = vadd.xlane.f32.xlu1 %v3491_v54  ;;  %v2054_v49 = vpop.xlane.xlu1 %2053  ;;  %v2243_v27 = vmul.f32 1.442695, %v4787_v22 }
 0x364   :  { %3502 = vpow2.f32 %v2241_v30  ;;  %v4791_v33 = vsub.f32 %v4536_v63, %v2054_v49  ;;  %2355 = vadd.xlane.f32.xlu0 %v3493_v38  ;;  %v2056_v39 = vpop.xlane.xlu0 %2055 }
 0x365   :  { %3504 = vpow2.f32 %v2239_v11  ;;  %v4795_v26 = vsub.f32 %v4539_v48, %v2056_v39 }
 0x366   :  { %v3495_v61 = vpop.eup %3494  ;;  %v2245_v34 = vmul.f32 1.442695, %v4791_v33 }
 0x367   :  { %v3497_v43 = vpop.eup %3496  ;;  %2361 = vadd.xlane.f32.xlu1 %v3495_v61  ;;  %v2058_v52 = vpop.xlane.xlu1 %2057  ;;  %v2247_v11 = vmul.f32 1.442695, %v4795_v26 }
 0x368   :  { %3506 = vpow2.f32 %v2245_v34  ;;  %v4799_v54 = vsub.f32 %v4544_v56, %v2058_v52  ;;  %2359 = vadd.xlane.f32.xlu0 %v3497_v43  ;;  %v2060_v63 = vpop.xlane.xlu0 %2059 }
 0x369   :  { %3508 = vpow2.f32 %v2243_v27  ;;  %v4803_v30 = vsub.f32 %v4547_v0, %v2060_v63 }
 0x36a   :  { %v3499_v48 = vpop.eup %3498  ;;  %v2249_v38 = vmul.f32 1.442695, %v4799_v54 }
 0x36b   :  { %v3501_v49 = vpop.eup %3500  ;;  %2365 = vadd.xlane.f32.xlu1 %v3499_v48  ;;  %v2062_v39 = vpop.xlane.xlu1 %2061  ;;  %v2251_v27 = vmul.f32 1.442695, %v4803_v30 }
 0x36c   :  { %3510 = vpow2.f32 %v2249_v38  ;;  %v4807_v61 = vsub.f32 %v4552_v8, %v2062_v39  ;;  %2363 = vadd.xlane.f32.xlu0 %v3501_v49  ;;  %v2064_v56 = vpop.xlane.xlu0 %2063 }
 0x36d   :  { %3512 = vpow2.f32 %v2247_v11  ;;  %v4811_v34 = vsub.f32 %v4555_v17, %v2064_v56 }
 0x36e   :  { %v3503_v0 = vpop.eup %3502  ;;  %v2253_v43 = vmul.f32 1.442695, %v4807_v61 }
 0x36f   :  { %v3505_v52 = vpop.eup %3504  ;;  %2369 = vadd.xlane.f32.xlu1 %v3503_v0  ;;  %v2066_v63 = vpop.xlane.xlu1 %2065  ;;  %v2255_v11 = vmul.f32 1.442695, %v4811_v34 }
 0x370   :  { %3514 = vpow2.f32 %v2253_v43  ;;  %v4815_v48 = vsub.f32 %v4560_v25, %v2066_v63  ;;  %2367 = vadd.xlane.f32.xlu0 %v3505_v52  ;;  %v2068_v8 = vpop.xlane.xlu0 %2067 }
 0x371   :  { %3516 = vpow2.f32 %v2251_v27  ;;  %v4819_v38 = vsub.f32 %v4563_v35, %v2068_v8 }
 0x372   :  { %v3507_v17 = vpop.eup %3506  ;;  %v2257_v49 = vmul.f32 1.442695, %v4815_v48 }
 0x373   :  { %v3509_v39 = vpop.eup %3508  ;;  %2373 = vadd.xlane.f32.xlu1 %v3507_v17  ;;  %v2070_v56 = vpop.xlane.xlu1 %2069  ;;  %v2259_v27 = vmul.f32 1.442695, %v4819_v38 }
 0x374   :  { %3518 = vpow2.f32 %v2257_v49  ;;  %v4823_v0 = vsub.f32 %v4568_v45, %v2070_v56  ;;  %2371 = vadd.xlane.f32.xlu0 %v3509_v39  ;;  %v2072_v25 = vpop.xlane.xlu0 %2071 }
 0x375   :  { %3520 = vpow2.f32 %v2255_v11  ;;  %v4827_v43 = vsub.f32 %v4571_v55, %v2072_v25 }
 0x376   :  { %v3511_v35 = vpop.eup %3510  ;;  %v2261_v52 = vmul.f32 1.442695, %v4823_v0 }
 0x377   :  { %v3513_v63 = vpop.eup %3512  ;;  %2377 = vadd.xlane.f32.xlu1 %v3511_v35  ;;  %v2074_v8 = vpop.xlane.xlu1 %2073  ;;  %v2263_v11 = vmul.f32 1.442695, %v4827_v43 }
 0x378   :  { %3522 = vpow2.f32 %v2261_v52  ;;  %v4831_v17 = vsub.f32 %v4576_v3, %v2074_v8  ;;  %2375 = vadd.xlane.f32.xlu0 %v3513_v63  ;;  %v2076_v45 = vpop.xlane.xlu0 %2075 }
 0x379   :  { %3524 = vpow2.f32 %v2259_v27  ;;  %v4835_v49 = vsub.f32 %v4579_v13, %v2076_v45 }
 0x37a   :  { %v3515_v55 = vpop.eup %3514  ;;  %v2265_v39 = vmul.f32 1.442695, %v4831_v17 }
 0x37b   :  { %v3517_v56 = vpop.eup %3516  ;;  %2381 = vadd.xlane.f32.xlu1 %v3515_v55  ;;  %v2078_v25 = vpop.xlane.xlu1 %2077  ;;  %v2267_v27 = vmul.f32 1.442695, %v4835_v49 }
 0x37c   :  { %3526 = vpow2.f32 %v2265_v39  ;;  %v4839_v35 = vsub.f32 %v4584_v24, %v2078_v25  ;;  %2379 = vadd.xlane.f32.xlu0 %v3517_v56  ;;  %v2080_v3 = vpop.xlane.xlu0 %2079 }
 0x37d   :  { %3528 = vpow2.f32 %v2263_v11  ;;  %v4843_v52 = vsub.f32 %v4587_v53, %v2080_v3 }
 0x37e   :  { %v3519_v13 = vpop.eup %3518  ;;  %v2269_v63 = vmul.f32 1.442695, %v4839_v35 }
 0x37f   :  { %v3521_v8 = vpop.eup %3520  ;;  %2385 = vadd.xlane.f32.xlu1 %v3519_v13  ;;  %v2082_v45 = vpop.xlane.xlu1 %2081  ;;  %v2271_v11 = vmul.f32 1.442695, %v4843_v52 }
 0x380   :  { %3530 = vpow2.f32 %v2269_v63  ;;  %v4847_v55 = vsub.f32 %v4592_v57, %v2082_v45  ;;  %2383 = vadd.xlane.f32.xlu0 %v3521_v8  ;;  %v2084_v24 = vpop.xlane.xlu0 %2083 }
 0x381   :  { %3532 = vpow2.f32 %v2267_v27  ;;  %v4851_v39 = vsub.f32 %v4595_v50, %v2084_v24 }
 0x382   :  { %v3523_v53 = vpop.eup %3522  ;;  %v2273_v56 = vmul.f32 1.442695, %v4847_v55 }
 0x383   :  { %v3525_v25 = vpop.eup %3524  ;;  %2389 = vadd.xlane.f32.xlu1 %v3523_v53  ;;  %v2086_v3 = vpop.xlane.xlu1 %2085  ;;  %v2275_v27 = vmul.f32 1.442695, %v4851_v39 }
 0x384   :  { %3534 = vpow2.f32 %v2273_v56  ;;  %v4855_v13 = vsub.f32 %v4600_v2, %v2086_v3  ;;  %2387 = vadd.xlane.f32.xlu0 %v3525_v25  ;;  %v2088_v57 = vpop.xlane.xlu0 %2087 }
 0x385   :  { %3536 = vpow2.f32 %v2271_v11  ;;  %v4859_v63 = vsub.f32 %v4603_v19, %v2088_v57 }
 0x386   :  { %v3527_v50 = vpop.eup %3526  ;;  %v2277_v8 = vmul.f32 1.442695, %v4855_v13 }
 0x387   :  { %5216 = vst [vmem:[#allocation15_spill] sm:$0xff] %v4859_v63  ;;  %v3529_v45 = vpop.eup %3528  ;;  %2393 = vadd.xlane.f32.xlu1 %v3527_v50  ;;  %v2090_v24 = vpop.xlane.xlu1 %2089  ;;  %v2279_v11 = vmul.f32 1.442695, %v4859_v63  ;;  %v5219_v50 = vld [vmem:[#allocation2_spill] sm:$0xff] }
 0x388   :  { %3538 = vpow2.f32 %v2277_v8  ;;  %v4863_v53 = vsub.f32 %v4608_v37, %v2090_v24  ;;  %2391 = vadd.xlane.f32.xlu0 %v3529_v45  ;;  %v2092_v2 = vpop.xlane.xlu0 %2091  ;;  %v5221_v45 = vld [vmem:[#allocation3_spill] sm:$0xff] }
 0x389   :  { %3540 = vpow2.f32 %v2275_v27  ;;  %v4867_v56 = vsub.f32 %v4611_v59, %v2092_v2 }
 0x38a   :  { %5217 = vst [vmem:[#allocation16_spill] sm:$0xff] %v4863_v53  ;;  %v3531_v19 = vpop.eup %3530  ;;  %v2281_v25 = vmul.f32 1.442695, %v4863_v53 }
 0x38b   :  { %5218 = vst [vmem:[#allocation17_spill] sm:$0xff] %v4867_v56  ;;  %v3533_v3 = vpop.eup %3532  ;;  %2397 = vadd.xlane.f32.xlu1 %v3531_v19  ;;  %v2094_v57 = vpop.xlane.xlu1 %2093  ;;  %v2283_v27 = vmul.f32 1.442695, %v4867_v56  ;;  %v5223_v19 = vld [vmem:[#allocation4_spill] sm:$0xff] }
 0x38c   :  { %3542 = vpow2.f32 %v2281_v25  ;;  %v4871_v8 = vsub.f32 %v5219_v50, %v2094_v57  ;;  %2395 = vadd.xlane.f32.xlu0 %v3533_v3  ;;  %v2096_v37 = vpop.xlane.xlu0 %2095  ;;  %v5225_v3 = vld [vmem:[#allocation5_spill] sm:$0xff] }
 0x38d   :  { %3544 = vpow2.f32 %v2279_v11  ;;  %v4875_v24 = vsub.f32 %v5221_v45, %v2096_v37 }
 0x38e   :  { %5220 = vst [vmem:[#allocation2_spill] sm:$0xff] %v4871_v8  ;;  %v3535_v59 = vpop.eup %3534  ;;  %v2285_v2 = vmul.f32 1.442695, %v4871_v8 }
 0x38f   :  { %5222 = vst [vmem:[#allocation3_spill] sm:$0xff] %v4875_v24  ;;  %v3537_v63 = vpop.eup %3536  ;;  %2401 = vadd.xlane.f32.xlu1 %v3535_v59  ;;  %v2098_v53 = vpop.xlane.xlu1 %2097  ;;  %v2287_v11 = vmul.f32 1.442695, %v4875_v24  ;;  %v5227_v59 = vld [vmem:[#allocation6_spill] sm:$0xff] }
 0x390   :  { %3546 = vpow2.f32 %v2285_v2  ;;  %v4879_v25 = vsub.f32 %v5223_v19, %v2098_v53  ;;  %2399 = vadd.xlane.f32.xlu0 %v3537_v63  ;;  %v2100_v57 = vpop.xlane.xlu0 %2099 }
 0x391   :  { %3548 = vpow2.f32 %v2283_v27  ;;  %v4883_v50 = vsub.f32 %v5225_v3, %v2100_v57  ;;  %v5229_v27 = vld [vmem:[#allocation7_spill] sm:$0xff] }
 0x392   :  { %5224 = vst [vmem:[#allocation4_spill] sm:$0xff] %v4879_v25  ;;  %v3539_v37 = vpop.eup %3538  ;;  %v2289_v45 = vmul.f32 1.442695, %v4879_v25 }
 0x393   :  { %5226 = vst [vmem:[#allocation5_spill] sm:$0xff] %v4883_v50  ;;  %v3541_v56 = vpop.eup %3540  ;;  %2405 = vadd.xlane.f32.xlu1 %v3539_v37  ;;  %v2102_v8 = vpop.xlane.xlu1 %2101  ;;  %v2291_v63 = vmul.f32 1.442695, %v4883_v50  ;;  %v5231_v37 = vld [vmem:[#allocation8_spill] sm:$0xff] }
 0x394   :  { %3550 = vpow2.f32 %v2289_v45  ;;  %v4887_v2 = vsub.f32 %v5227_v59, %v2102_v8  ;;  %2403 = vadd.xlane.f32.xlu0 %v3541_v56  ;;  %v2104_v53 = vpop.xlane.xlu0 %2103 }
 0x395   :  { %3552 = vpow2.f32 %v2287_v11  ;;  %v4891_v19 = vsub.f32 %v5229_v27, %v2104_v53  ;;  %v5232_v11 = vld [vmem:[#allocation9_spill] sm:$0xff] }
 0x396   :  { %5228 = vst [vmem:[#allocation6_spill] sm:$0xff] %v4887_v2  ;;  %v3543_v57 = vpop.eup %3542  ;;  %v2293_v3 = vmul.f32 1.442695, %v4887_v2 }
 0x397   :  { %5230 = vst [vmem:[#allocation7_spill] sm:$0xff] %v4891_v19  ;;  %v3545_v24 = vpop.eup %3544  ;;  %2409 = vadd.xlane.f32.xlu1 %v3543_v57  ;;  %v2106_v25 = vpop.xlane.xlu1 %2105  ;;  %v2295_v56 = vmul.f32 1.442695, %v4891_v19  ;;  %v5233_v57 = vld [vmem:[#allocation10_spill] sm:$0xff] }
 0x398   :  { %3554 = vpow2.f32 %v2293_v3  ;;  %v4895_v45 = vsub.f32 %v5231_v37, %v2106_v25  ;;  %2407 = vadd.xlane.f32.xlu0 %v3545_v24  ;;  %v2108_v8 = vpop.xlane.xlu0 %2107 }
 0x399   :  { %3556 = vpow2.f32 %v2291_v63  ;;  %v4899_v59 = vsub.f32 %v5232_v11, %v2108_v8 }
 0x39a   :  { %v3547_v53 = vpop.eup %3546  ;;  %v2297_v27 = vmul.f32 1.442695, %v4895_v45 }
 0x39b   :  { %v3549_v50 = vpop.eup %3548  ;;  %2413 = vadd.xlane.f32.xlu1 %v3547_v53  ;;  %v2110_v2 = vpop.xlane.xlu1 %2109  ;;  %v2299_v24 = vmul.f32 1.442695, %v4899_v59  ;;  %v5235_v53 = vld [vmem:[#allocation11_spill] sm:$0xff] }
 0x39c   :  { %3558 = vpow2.f32 %v2297_v27  ;;  %v4903_v3 = vsub.f32 %v5233_v57, %v2110_v2  ;;  %2411 = vadd.xlane.f32.xlu0 %v3549_v50  ;;  %v2112_v25 = vpop.xlane.xlu0 %2111 }
 0x39d   :  { %3560 = vpow2.f32 %v2295_v56  ;;  %v4907_v63 = vsub.f32 %v4651_v47, %v2112_v25 }
 0x39e   :  { %v3551_v37 = vpop.eup %3550  ;;  %v2301_v8 = vmul.f32 1.442695, %v4903_v3 }
 0x39f   :  { %5234 = vst [vmem:[#allocation8_spill] sm:$0xff] %v4907_v63  ;;  %v3553_v11 = vpop.eup %3552  ;;  %2417 = vadd.xlane.f32.xlu1 %v3551_v37  ;;  %v2114_v19 = vpop.xlane.xlu1 %2113  ;;  %v2303_v50 = vmul.f32 1.442695, %v4907_v63  ;;  %v5237_v63 = vld [vmem:[#allocation12_spill] sm:$0xff] }
 0x3a0   :  { %3562 = vpow2.f32 %v2301_v8  ;;  %v4911_v27 = vsub.f32 %v5235_v53, %v2114_v19  ;;  %2415 = vadd.xlane.f32.xlu0 %v3553_v11 }
 0x3a1   :  { %3564 = vpow2.f32 %v2299_v24 }
 0x3a2   :  { %5236 = vst [vmem:[#allocation9_spill] sm:$0xff] %v4911_v27  ;;  %v3555_v2 = vpop.eup %3554  ;;  %v2305_v56 = vmul.f32 1.442695, %v4911_v27 }
 0x3a3   :  { %v3557_v57 = vpop.eup %3556  ;;  %2421 = vadd.xlane.f32.xlu1 %v3555_v2 }
 0x3a4   :  { %3566 = vpow2.f32 %v2305_v56  ;;  %2419 = vadd.xlane.f32.xlu0 %v3557_v57 }
 0x3a5   :  { %3568 = vpow2.f32 %v2303_v50 }
 0x3a6   :  { %v3559_v47 = vpop.eup %3558 }
 0x3a7   :  { %v3561_v25 = vpop.eup %3560  ;;  %2425 = vadd.xlane.f32.xlu1 %v3559_v47 }
 0x3a8   :  { %2423 = vadd.xlane.f32.xlu0 %v3561_v25 }
 0x3aa   :  { %v3563_v37 = vpop.eup %3562 }
 0x3ab   :  { %v3565_v8 = vpop.eup %3564  ;;  %2429 = vadd.xlane.f32.xlu1 %v3563_v37 }
 0x3ac   :  { %2427 = vadd.xlane.f32.xlu0 %v3565_v8 }
 0x3ae   :  { %v3567_v19 = vpop.eup %3566 }
 0x3af   :  { %v3569_v24 = vpop.eup %3568  ;;  %2433 = vadd.xlane.f32.xlu1 %v3567_v19 }
 0x3b0   :  { %2431 = vadd.xlane.f32.xlu0 %v3569_v24 }
 0x3bc   :  { %v2310_v11 = vpop.xlane.xlu1 %2309 }
 0x3bd   :  { %3570 = vlog2.f32 %v2310_v11 }
 0x3c0   :  { %v2314_v53 = vpop.xlane.xlu1 %2313 }
 0x3c1   :  { %3572 = vlog2.f32 %v2314_v53  ;;  %v2308_v2 = vpop.xlane.xlu0 %2307 }
 0x3c2   :  { %3574 = vlog2.f32 %v2308_v2 }
 0x3c5   :  { %v2312_v56 = vpop.xlane.xlu0 %2311 }
 0x3c6   :  { %3576 = vlog2.f32 %v2312_v56 }
 0x3c7   :  { %v3571_v50 = vpop.eup %3570 }
 0x3c8   :  { %v2438_v57 = vmul.f32 0.6931472, %v3571_v50  ;;  %v2318_v47 = vpop.xlane.xlu1 %2317 }
 0x3c9   :  { %3578 = vlog2.f32 %v2318_v47  ;;  %v2316_v25 = vpop.xlane.xlu0 %2315 }
 0x3ca   :  { %v2564_v37 = vsub.f32 %v5237_v63, %v2438_v57  ;;  %3580 = vlog2.f32 %v2316_v25 }
 0x3cb   :  { %v3573_v8 = vpop.eup %3572 }
 0x3cc   :  { %v3575_v27 = vpop.eup %3574  ;;  %2628 = vst [vmem:[%s5178_s7 + $0x8] sm:$0xff] %v2564_v37  ;;  %v2442_v19 = vmul.f32 0.6931472, %v3573_v8  ;;  %v2322_v24 = vpop.xlane.xlu1 %2321 }
 0x3cd   :  { %v2436_v11 = vmul.f32 0.6931472, %v3575_v27  ;;  %3582 = vlog2.f32 %v2322_v24  ;;  %v2320_v53 = vpop.xlane.xlu0 %2319 }
 0x3ce   :  { %v2566_v2 = vsub.f32 %v4664_v10, %v2442_v19  ;;  %3584 = vlog2.f32 %v2320_v53  ;;  %v5238_v53 = vld [vmem:[#allocation13_spill] sm:$0xff] }
 0x3cf   :  { %v2563_v56 = vsub.f32 %v4667_v28, %v2436_v11 }
 0x3d0   :  { %v3577_v50 = vpop.eup %3576  ;;  %2630 = vst [vmem:[%s5178_s7 + $0x18] sm:$0xff] %v2566_v2  ;;  %v2326_v63 = vpop.xlane.xlu1 %2325 }
 0x3d1   :  { %2627 = vst [vmem:[%s5178_s7] sm:$0xff] %v2563_v56  ;;  %v2440_v57 = vmul.f32 0.6931472, %v3577_v50  ;;  %3586 = vlog2.f32 %v2326_v63  ;;  %v2324_v27 = vpop.xlane.xlu0 %2323 }
 0x3d2   :  { %3588 = vlog2.f32 %v2324_v27 }
 0x3d3   :  { %v3579_v47 = vpop.eup %3578  ;;  %v2565_v10 = vsub.f32 %v4672_v31, %v2440_v57 }
 0x3d4   :  { %v3581_v25 = vpop.eup %3580  ;;  %v2446_v37 = vmul.f32 0.6931472, %v3579_v47  ;;  %v2330_v28 = vpop.xlane.xlu1 %2329 }
 0x3d5   :  { %2629 = vst [vmem:[%s5178_s7 + $0x10] sm:$0xff] %v2565_v10  ;;  %v2444_v8 = vmul.f32 0.6931472, %v3581_v25  ;;  %3590 = vlog2.f32 %v2330_v28  ;;  %v2328_v19 = vpop.xlane.xlu0 %2327 }
 0x3d6   :  { %v2568_v24 = vsub.f32 %v4679_v60, %v2446_v37  ;;  %3592 = vlog2.f32 %v2328_v19 }
 0x3d7   :  { %v3583_v11 = vpop.eup %3582  ;;  %v2567_v2 = vsub.f32 %v5238_v53, %v2444_v8 }
 0x3d8   :  { %v3585_v56 = vpop.eup %3584  ;;  %2632 = vst [vmem:[%s5178_s7 + $0x28] sm:$0xff] %v2568_v24  ;;  %v2450_v31 = vmul.f32 0.6931472, %v3583_v11  ;;  %v2334_v50 = vpop.xlane.xlu1 %2333 }
 0x3d9   :  { %2631 = vst [vmem:[%s5178_s7 + $0x20] sm:$0xff] %v2567_v2  ;;  %v2448_v63 = vmul.f32 0.6931472, %v3585_v56  ;;  %3594 = vlog2.f32 %v2334_v50  ;;  %v2332_v57 = vpop.xlane.xlu0 %2331  ;;  %v5239_v50 = vld [vmem:[#allocation14_spill] sm:$0xff] }
 0x3da   :  { %v2570_v60 = vsub.f32 %v4687_v1, %v2450_v31  ;;  %3596 = vlog2.f32 %v2332_v57 }
 0x3db   :  { %v3587_v27 = vpop.eup %3586  ;;  %v2569_v47 = vsub.f32 %v4683_v15, %v2448_v63 }
 0x3dc   :  { %v3589_v10 = vpop.eup %3588  ;;  %2634 = vst [vmem:[%s5178_s7 + $0x38] sm:$0xff] %v2570_v60  ;;  %v2454_v25 = vmul.f32 0.6931472, %v3587_v27  ;;  %v2338_v37 = vpop.xlane.xlu1 %2337 }
 0x3dd   :  { %2633 = vst [vmem:[%s5178_s7 + $0x30] sm:$0xff] %v2569_v47  ;;  %v2452_v28 = vmul.f32 0.6931472, %v3589_v10  ;;  %3598 = vlog2.f32 %v2338_v37  ;;  %v2336_v8 = vpop.xlane.xlu0 %2335 }
 0x3de   :  { %v2572_v1 = vsub.f32 %v4695_v62, %v2454_v25  ;;  %3600 = vlog2.f32 %v2336_v8 }
 0x3df   :  { %v3591_v19 = vpop.eup %3590  ;;  %v2571_v15 = vsub.f32 %v4691_v42, %v2452_v28 }
 0x3e0   :  { %v3593_v24 = vpop.eup %3592  ;;  %2636 = vst [vmem:[%s5178_s7 + $0x48] sm:$0xff] %v2572_v1  ;;  %v2458_v11 = vmul.f32 0.6931472, %v3591_v19  ;;  %v2342_v53 = vpop.xlane.xlu1 %2341 }
 0x3e1   :  { %2635 = vst [vmem:[%s5178_s7 + $0x40] sm:$0xff] %v2571_v15  ;;  %v2456_v2 = vmul.f32 0.6931472, %v3593_v24  ;;  %3602 = vlog2.f32 %v2342_v53  ;;  %v2340_v56 = vpop.xlane.xlu0 %2339 }
 0x3e2   :  { %v2574_v62 = vsub.f32 %v4703_v40, %v2458_v11  ;;  %3604 = vlog2.f32 %v2340_v56 }
 0x3e3   :  { %v3595_v31 = vpop.eup %3594  ;;  %v2573_v42 = vsub.f32 %v5239_v50, %v2456_v2 }
 0x3e4   :  { %v3597_v63 = vpop.eup %3596  ;;  %2638 = vst [vmem:[%s5178_s7 + $0x58] sm:$0xff] %v2574_v62  ;;  %v2462_v57 = vmul.f32 0.6931472, %v3595_v31  ;;  %v2346_v60 = vpop.xlane.xlu1 %2345 }
 0x3e5   :  { %2637 = vst [vmem:[%s5178_s7 + $0x50] sm:$0xff] %v2573_v42  ;;  %v2460_v27 = vmul.f32 0.6931472, %v3597_v63  ;;  %3606 = vlog2.f32 %v2346_v60  ;;  %v2344_v47 = vpop.xlane.xlu0 %2343 }
 0x3e6   :  { %v2576_v40 = vsub.f32 %v4711_v51, %v2462_v57  ;;  %3608 = vlog2.f32 %v2344_v47 }
 0x3e7   :  { %v3599_v10 = vpop.eup %3598  ;;  %v2575_v25 = vsub.f32 %v4707_v58, %v2460_v27 }
 0x3e8   :  { %v3601_v37 = vpop.eup %3600  ;;  %2640 = vst [vmem:[%s5178_s7 + $0x68] sm:$0xff] %v2576_v40  ;;  %v2466_v28 = vmul.f32 0.6931472, %v3599_v10  ;;  %v2350_v8 = vpop.xlane.xlu1 %2349 }
 0x3e9   :  { %2639 = vst [vmem:[%s5178_s7 + $0x60] sm:$0xff] %v2575_v25  ;;  %v2464_v1 = vmul.f32 0.6931472, %v3601_v37  ;;  %3610 = vlog2.f32 %v2350_v8  ;;  %v2348_v19 = vpop.xlane.xlu0 %2347 }
 0x3ea   :  { %v2578_v51 = vsub.f32 %v4719_v4, %v2466_v28  ;;  %3612 = vlog2.f32 %v2348_v19 }
 0x3eb   :  { %v3603_v15 = vpop.eup %3602  ;;  %v2577_v58 = vsub.f32 %v4715_v9, %v2464_v1 }
 0x3ec   :  { %v3605_v24 = vpop.eup %3604  ;;  %2642 = vst [vmem:[%s5178_s7 + $0x78] sm:$0xff] %v2578_v51  ;;  %v2470_v11 = vmul.f32 0.6931472, %v3603_v15  ;;  %v2354_v53 = vpop.xlane.xlu1 %2353 }
 0x3ed   :  { %2641 = vst [vmem:[%s5178_s7 + $0x70] sm:$0xff] %v2577_v58  ;;  %v2468_v2 = vmul.f32 0.6931472, %v3605_v24  ;;  %3614 = vlog2.f32 %v2354_v53  ;;  %v2352_v56 = vpop.xlane.xlu0 %2351 }
 0x3ee   :  { %v2580_v4 = vsub.f32 %v4727_v18, %v2470_v11  ;;  %3616 = vlog2.f32 %v2352_v56 }
 0x3ef   :  { %v3607_v62 = vpop.eup %3606  ;;  %v2579_v9 = vsub.f32 %v4723_v12, %v2468_v2 }
 0x3f0   :  { %v3609_v31 = vpop.eup %3608  ;;  %2644 = vst [vmem:[%s5178_s7 + $0x88] sm:$0xff] %v2580_v4  ;;  %v2474_v50 = vmul.f32 0.6931472, %v3607_v62  ;;  %v2358_v42 = vpop.xlane.xlu1 %2357 }
 0x3f1   :  { %2643 = vst [vmem:[%s5178_s7 + $0x80] sm:$0xff] %v2579_v9  ;;  %v2472_v63 = vmul.f32 0.6931472, %v3609_v31  ;;  %3618 = vlog2.f32 %v2358_v42  ;;  %v2356_v57 = vpop.xlane.xlu0 %2355 }
 0x3f2   :  { %v2582_v18 = vsub.f32 %v4735_v21, %v2474_v50  ;;  %3620 = vlog2.f32 %v2356_v57 }
 0x3f3   :  { %v3611_v60 = vpop.eup %3610  ;;  %v2581_v12 = vsub.f32 %v4731_v5, %v2472_v63 }
 0x3f4   :  { %v3613_v27 = vpop.eup %3612  ;;  %2646 = vst [vmem:[%s5178_s7 + $0x98] sm:$0xff] %v2582_v18  ;;  %v2478_v47 = vmul.f32 0.6931472, %v3611_v60  ;;  %v2362_v40 = vpop.xlane.xlu1 %2361 }
 0x3f5   :  { %2645 = vst [vmem:[%s5178_s7 + $0x90] sm:$0xff] %v2581_v12  ;;  %v2476_v10 = vmul.f32 0.6931472, %v3613_v27  ;;  %3622 = vlog2.f32 %v2362_v40  ;;  %v2360_v25 = vpop.xlane.xlu0 %2359 }
 0x3f6   :  { %v2584_v21 = vsub.f32 %v4743_v23, %v2478_v47  ;;  %3624 = vlog2.f32 %v2360_v25 }
 0x3f7   :  { %v3615_v37 = vpop.eup %3614  ;;  %v2583_v5 = vsub.f32 %v4739_v16, %v2476_v10 }
 0x3f8   :  { %v3617_v28 = vpop.eup %3616  ;;  %2648 = vst [vmem:[%s5178_s7 + $0xa8] sm:$0xff] %v2584_v21  ;;  %v2482_v8 = vmul.f32 0.6931472, %v3615_v37  ;;  %v2366_v1 = vpop.xlane.xlu1 %2365 }
 0x3f9   :  { %2647 = vst [vmem:[%s5178_s7 + $0xa0] sm:$0xff] %v2583_v5  ;;  %v2480_v19 = vmul.f32 0.6931472, %v3617_v28  ;;  %3626 = vlog2.f32 %v2366_v1  ;;  %v2364_v51 = vpop.xlane.xlu0 %2363 }
 0x3fa   :  { %v2586_v23 = vsub.f32 %v4751_v29, %v2482_v8  ;;  %3628 = vlog2.f32 %v2364_v51 }
 0x3fb   :  { %v3619_v15 = vpop.eup %3618  ;;  %v2585_v16 = vsub.f32 %v4747_v44, %v2480_v19 }
 0x3fc   :  { %v3621_v58 = vpop.eup %3620  ;;  %2650 = vst [vmem:[%s5178_s7 + $0xb8] sm:$0xff] %v2586_v23  ;;  %v2486_v24 = vmul.f32 0.6931472, %v3619_v15  ;;  %v2370_v11 = vpop.xlane.xlu1 %2369 }
 0x3fd   :  { %2649 = vst [vmem:[%s5178_s7 + $0xb0] sm:$0xff] %v2585_v16  ;;  %v2484_v53 = vmul.f32 0.6931472, %v3621_v58  ;;  %3630 = vlog2.f32 %v2370_v11  ;;  %v2368_v2 = vpop.xlane.xlu0 %2367 }
 0x3fe   :  { %v2588_v29 = vsub.f32 %v4759_v32, %v2486_v24  ;;  %3632 = vlog2.f32 %v2368_v2 }
 0x3ff   :  { %v3623_v56 = vpop.eup %3622  ;;  %v2587_v44 = vsub.f32 %v4755_v7, %v2484_v53 }
 0x400   :  { %v3625_v4 = vpop.eup %3624  ;;  %2652 = vst [vmem:[%s5178_s7 + $0xc8] sm:$0xff] %v2588_v29  ;;  %v2490_v62 = vmul.f32 0.6931472, %v3623_v56  ;;  %v2374_v9 = vpop.xlane.xlu1 %2373 }
 0x401   :  { %2651 = vst [vmem:[%s5178_s7 + $0xc0] sm:$0xff] %v2587_v44  ;;  %v2488_v31 = vmul.f32 0.6931472, %v3625_v4  ;;  %3634 = vlog2.f32 %v2374_v9  ;;  %v2372_v50 = vpop.xlane.xlu0 %2371 }
 0x402   :  { %v2590_v32 = vsub.f32 %v4767_v36, %v2490_v62  ;;  %3636 = vlog2.f32 %v2372_v50 }
 0x403   :  { %v3627_v42 = vpop.eup %3626  ;;  %v2589_v7 = vsub.f32 %v4763_v6, %v2488_v31 }
 0x404   :  { %v3629_v63 = vpop.eup %3628  ;;  %2654 = vst [vmem:[%s5178_s7 + $0xd8] sm:$0xff] %v2590_v32  ;;  %v2494_v57 = vmul.f32 0.6931472, %v3627_v42  ;;  %v2378_v18 = vpop.xlane.xlu1 %2377 }
 0x405   :  { %2653 = vst [vmem:[%s5178_s7 + $0xd0] sm:$0xff] %v2589_v7  ;;  %v2492_v60 = vmul.f32 0.6931472, %v3629_v63  ;;  %3638 = vlog2.f32 %v2378_v18  ;;  %v2376_v12 = vpop.xlane.xlu0 %2375 }
 0x406   :  { %v2592_v36 = vsub.f32 %v4775_v41, %v2494_v57  ;;  %3640 = vlog2.f32 %v2376_v12 }
 0x407   :  { %v3631_v27 = vpop.eup %3630  ;;  %v2591_v6 = vsub.f32 %v4771_v14, %v2492_v60 }
 0x408   :  { %v3633_v47 = vpop.eup %3632  ;;  %2656 = vst [vmem:[%s5178_s7 + $0xe8] sm:$0xff] %v2592_v36  ;;  %v2498_v40 = vmul.f32 0.6931472, %v3631_v27  ;;  %v2382_v10 = vpop.xlane.xlu1 %2381 }
 0x409   :  { %2655 = vst [vmem:[%s5178_s7 + $0xe0] sm:$0xff] %v2591_v6  ;;  %v2496_v25 = vmul.f32 0.6931472, %v3633_v47  ;;  %3642 = vlog2.f32 %v2382_v10  ;;  %v2380_v21 = vpop.xlane.xlu0 %2379 }
 0x40a   :  { %v2594_v41 = vsub.f32 %v4783_v46, %v2498_v40  ;;  %3644 = vlog2.f32 %v2380_v21 }
 0x40b   :  { %v3635_v37 = vpop.eup %3634  ;;  %v2593_v14 = vsub.f32 %v4779_v20, %v2496_v25 }
 0x40c   :  { %v3637_v5 = vpop.eup %3636  ;;  %2658 = vst [vmem:[%s5178_s7 + $0xf8] sm:$0xff] %v2594_v41  ;;  %v2502_v28 = vmul.f32 0.6931472, %v3635_v37  ;;  %v2386_v8 = vpop.xlane.xlu1 %2385 }
 0x40d   :  { %2657 = vst [vmem:[%s5178_s7 + $0xf0] sm:$0xff] %v2593_v14  ;;  %v2500_v1 = vmul.f32 0.6931472, %v3637_v5  ;;  %3646 = vlog2.f32 %v2386_v8  ;;  %v2384_v19 = vpop.xlane.xlu0 %2383 }
 0x40e   :  { %v2596_v46 = vsub.f32 %v4791_v33, %v2502_v28  ;;  %3648 = vlog2.f32 %v2384_v19 }
 0x40f   :  { %v3639_v51 = vpop.eup %3638  ;;  %v2595_v20 = vsub.f32 %v4787_v22, %v2500_v1 }
 0x410   :  { %v3641_v23 = vpop.eup %3640  ;;  %2660 = vst [vmem:[%s5178_s7 + $0x108] sm:$0xff] %v2596_v46  ;;  %v2506_v15 = vmul.f32 0.6931472, %v3639_v51  ;;  %v2390_v16 = vpop.xlane.xlu1 %2389 }
 0x411   :  { %2659 = vst [vmem:[%s5178_s7 + $0x100] sm:$0xff] %v2595_v20  ;;  %v2504_v58 = vmul.f32 0.6931472, %v3641_v23  ;;  %3650 = vlog2.f32 %v2390_v16  ;;  %v2388_v24 = vpop.xlane.xlu0 %2387 }
 0x412   :  { %v2598_v33 = vsub.f32 %v4799_v54, %v2506_v15  ;;  %3652 = vlog2.f32 %v2388_v24 }
 0x413   :  { %v3643_v11 = vpop.eup %3642  ;;  %v2597_v22 = vsub.f32 %v4795_v26, %v2504_v58 }
 0x414   :  { %v3645_v53 = vpop.eup %3644  ;;  %2662 = vst [vmem:[%s5178_s7 + $0x118] sm:$0xff] %v2598_v33  ;;  %v2510_v2 = vmul.f32 0.6931472, %v3643_v11  ;;  %v2394_v29 = vpop.xlane.xlu1 %2393 }
 0x415   :  { %2661 = vst [vmem:[%s5178_s7 + $0x110] sm:$0xff] %v2597_v22  ;;  %v2508_v56 = vmul.f32 0.6931472, %v3645_v53  ;;  %3654 = vlog2.f32 %v2394_v29  ;;  %v2392_v44 = vpop.xlane.xlu0 %2391  ;;  %v5240_v29 = vld [vmem:[#allocation16_spill] sm:$0xff] }
 0x416   :  { %v2600_v54 = vsub.f32 %v4807_v61, %v2510_v2  ;;  %3656 = vlog2.f32 %v2392_v44  ;;  %v5241_v44 = vld [vmem:[#allocation15_spill] sm:$0xff] }
 0x417   :  { %v3647_v4 = vpop.eup %3646  ;;  %v2599_v26 = vsub.f32 %v4803_v30, %v2508_v56 }
 0x418   :  { %v3649_v62 = vpop.eup %3648  ;;  %2664 = vst [vmem:[%s5178_s7 + $0x128] sm:$0xff] %v2600_v54  ;;  %v2514_v9 = vmul.f32 0.6931472, %v3647_v4  ;;  %v2398_v31 = vpop.xlane.xlu1 %2397 }
 0x419   :  { %2663 = vst [vmem:[%s5178_s7 + $0x120] sm:$0xff] %v2599_v26  ;;  %v2512_v50 = vmul.f32 0.6931472, %v3649_v62  ;;  %3658 = vlog2.f32 %v2398_v31  ;;  %v2396_v32 = vpop.xlane.xlu0 %2395  ;;  %v5242_v31 = vld [vmem:[#allocation2_spill] sm:$0xff] }
 0x41a   :  { %v2602_v61 = vsub.f32 %v4815_v48, %v2514_v9  ;;  %3660 = vlog2.f32 %v2396_v32 }
 0x41b   :  { %v3651_v42 = vpop.eup %3650  ;;  %v2601_v30 = vsub.f32 %v4811_v34, %v2512_v50 }
 0x41c   :  { %v3653_v7 = vpop.eup %3652  ;;  %2666 = vst [vmem:[%s5178_s7 + $0x138] sm:$0xff] %v2602_v61  ;;  %v2518_v63 = vmul.f32 0.6931472, %v3651_v42  ;;  %v2402_v57 = vpop.xlane.xlu1 %2401  ;;  %v5243_v61 = vld [vmem:[#allocation17_spill] sm:$0xff] }
 0x41d   :  { %2665 = vst [vmem:[%s5178_s7 + $0x130] sm:$0xff] %v2601_v30  ;;  %v2516_v18 = vmul.f32 0.6931472, %v3653_v7  ;;  %3662 = vlog2.f32 %v2402_v57  ;;  %v2400_v60 = vpop.xlane.xlu0 %2399 }
 0x41e   :  { %v2604_v48 = vsub.f32 %v4823_v0, %v2518_v63  ;;  %3664 = vlog2.f32 %v2400_v60  ;;  %v5244_v60 = vld [vmem:[#allocation4_spill] sm:$0xff] }
 0x41f   :  { %v3655_v12 = vpop.eup %3654  ;;  %v2603_v34 = vsub.f32 %v4819_v38, %v2516_v18 }
 0x420   :  { %v3657_v36 = vpop.eup %3656  ;;  %2668 = vst [vmem:[%s5178_s7 + $0x148] sm:$0xff] %v2604_v48  ;;  %v2522_v27 = vmul.f32 0.6931472, %v3655_v12  ;;  %v2406_v6 = vpop.xlane.xlu1 %2405 }
 0x421   :  { %2667 = vst [vmem:[%s5178_s7 + $0x140] sm:$0xff] %v2603_v34  ;;  %v2520_v47 = vmul.f32 0.6931472, %v3657_v36  ;;  %3666 = vlog2.f32 %v2406_v6  ;;  %v2404_v40 = vpop.xlane.xlu0 %2403  ;;  %v5245_v34 = vld [vmem:[#allocation3_spill] sm:$0xff] }
 0x422   :  { %v2606_v0 = vsub.f32 %v4831_v17, %v2522_v27  ;;  %3668 = vlog2.f32 %v2404_v40 }
 0x423   :  { %v3659_v10 = vpop.eup %3658  ;;  %v2605_v38 = vsub.f32 %v4827_v43, %v2520_v47 }
 0x424   :  { %v3661_v25 = vpop.eup %3660  ;;  %2670 = vst [vmem:[%s5178_s7 + $0x158] sm:$0xff] %v2606_v0  ;;  %v2526_v21 = vmul.f32 0.6931472, %v3659_v10  ;;  %v2410_v41 = vpop.xlane.xlu1 %2409  ;;  %v5246_v10 = vld [vmem:[#allocation6_spill] sm:$0xff] }
 0x425   :  { %2669 = vst [vmem:[%s5178_s7 + $0x150] sm:$0xff] %v2605_v38  ;;  %v2524_v37 = vmul.f32 0.6931472, %v3661_v25  ;;  %3670 = vlog2.f32 %v2410_v41  ;;  %v2408_v14 = vpop.xlane.xlu0 %2407 }
 0x426   :  { %v2608_v17 = vsub.f32 %v4839_v35, %v2526_v21  ;;  %3672 = vlog2.f32 %v2408_v14  ;;  %v5247_v21 = vld [vmem:[#allocation5_spill] sm:$0xff] }
 0x427   :  { %v3663_v5 = vpop.eup %3662  ;;  %v2607_v43 = vsub.f32 %v4835_v49, %v2524_v37 }
 0x428   :  { %v3665_v28 = vpop.eup %3664  ;;  %2672 = vst [vmem:[%s5178_s7 + $0x168] sm:$0xff] %v2608_v17  ;;  %v2530_v8 = vmul.f32 0.6931472, %v3663_v5  ;;  %v2414_v1 = vpop.xlane.xlu1 %2413 }
 0x429   :  { %2671 = vst [vmem:[%s5178_s7 + $0x160] sm:$0xff] %v2607_v43  ;;  %v2528_v19 = vmul.f32 0.6931472, %v3665_v28  ;;  %3674 = vlog2.f32 %v2414_v1  ;;  %v2412_v46 = vpop.xlane.xlu0 %2411  ;;  %v5248_v28 = vld [vmem:[#allocation7_spill] sm:$0xff] }
 0x42a   :  { %v2610_v35 = vsub.f32 %v4847_v55, %v2530_v8  ;;  %3676 = vlog2.f32 %v2412_v46 }
 0x42b   :  { %v3667_v51 = vpop.eup %3666  ;;  %v2609_v49 = vsub.f32 %v4843_v52, %v2528_v19 }
 0x42c   :  { %v3669_v20 = vpop.eup %3668  ;;  %2674 = vst [vmem:[%s5178_s7 + $0x178] sm:$0xff] %v2610_v35  ;;  %v2534_v23 = vmul.f32 0.6931472, %v3667_v51  ;;  %v2418_v15 = vpop.xlane.xlu1 %2417 }
 0x42d   :  { %2673 = vst [vmem:[%s5178_s7 + $0x170] sm:$0xff] %v2609_v49  ;;  %v2532_v16 = vmul.f32 0.6931472, %v3669_v20  ;;  %3678 = vlog2.f32 %v2418_v15  ;;  %v2416_v58 = vpop.xlane.xlu0 %2415  ;;  %v5249_v15 = vld [vmem:[#allocation9_spill] sm:$0xff] }
 0x42e   :  { %v2612_v55 = vsub.f32 %v4855_v13, %v2534_v23  ;;  %3680 = vlog2.f32 %v2416_v58  ;;  %v5250_v58 = vld [vmem:[#allocation8_spill] sm:$0xff] }
 0x42f   :  { %v3671_v24 = vpop.eup %3670  ;;  %v2611_v52 = vsub.f32 %v4851_v39, %v2532_v16 }
 0x430   :  { %v3673_v33 = vpop.eup %3672  ;;  %2676 = vst [vmem:[%s5178_s7 + $0x188] sm:$0xff] %v2612_v55  ;;  %v2538_v11 = vmul.f32 0.6931472, %v3671_v24  ;;  %v2422_v22 = vpop.xlane.xlu1 %2421 }
 0x431   :  { %2675 = vst [vmem:[%s5178_s7 + $0x180] sm:$0xff] %v2611_v52  ;;  %v2536_v53 = vmul.f32 0.6931472, %v3673_v33  ;;  %3682 = vlog2.f32 %v2422_v22  ;;  %v2420_v2 = vpop.xlane.xlu0 %2419 }
 0x432   :  { %v2614_v13 = vsub.f32 %v5240_v29, %v2538_v11  ;;  %3684 = vlog2.f32 %v2420_v2 }
 0x433   :  { %v3675_v56 = vpop.eup %3674  ;;  %v2613_v39 = vsub.f32 %v5241_v44, %v2536_v53 }
 0x434   :  { %v3677_v54 = vpop.eup %3676  ;;  %2678 = vst [vmem:[%s5178_s7 + $0x198] sm:$0xff] %v2614_v13  ;;  %v2542_v4 = vmul.f32 0.6931472, %v3675_v56  ;;  %v2426_v26 = vpop.xlane.xlu1 %2425 }
 0x435   :  { %2677 = vst [vmem:[%s5178_s7 + $0x190] sm:$0xff] %v2613_v39  ;;  %v2540_v62 = vmul.f32 0.6931472, %v3677_v54  ;;  %3686 = vlog2.f32 %v2426_v26  ;;  %v2424_v9 = vpop.xlane.xlu0 %2423 }
 0x436   :  { %v2616_v50 = vsub.f32 %v5242_v31, %v2542_v4  ;;  %3688 = vlog2.f32 %v2424_v9 }
 0x437   :  { %v3679_v32 = vpop.eup %3678  ;;  %v2615_v42 = vsub.f32 %v5243_v61, %v2540_v62 }
 0x438   :  { %v3681_v30 = vpop.eup %3680  ;;  %2680 = vst [vmem:[%s5178_s7 + $0x1a8] sm:$0xff] %v2616_v50  ;;  %v2546_v7 = vmul.f32 0.6931472, %v3679_v32  ;;  %v2430_v63 = vpop.xlane.xlu1 %2429 }
 0x439   :  { %2679 = vst [vmem:[%s5178_s7 + $0x1a0] sm:$0xff] %v2615_v42  ;;  %v2544_v57 = vmul.f32 0.6931472, %v3681_v30  ;;  %3690 = vlog2.f32 %v2430_v63  ;;  %v2428_v18 = vpop.xlane.xlu0 %2427 }
 0x43a   :  { %v2618_v48 = vsub.f32 %v5244_v60, %v2546_v7  ;;  %3692 = vlog2.f32 %v2428_v18 }
 0x43b   :  { %v3683_v12 = vpop.eup %3682  ;;  %v2617_v36 = vsub.f32 %v5245_v34, %v2544_v57 }
 0x43c   :  { %v3685_v27 = vpop.eup %3684  ;;  %2682 = vst [vmem:[%s5178_s7 + $0x1b8] sm:$0xff] %v2618_v48  ;;  %v2550_v6 = vmul.f32 0.6931472, %v3683_v12  ;;  %v2434_v47 = vpop.xlane.xlu1 %2433 }
 0x43d   :  { %2681 = vst [vmem:[%s5178_s7 + $0x1b0] sm:$0xff] %v2617_v36  ;;  %v2548_v40 = vmul.f32 0.6931472, %v3685_v27  ;;  %3694 = vlog2.f32 %v2434_v47  ;;  %v2432_v0 = vpop.xlane.xlu0 %2431 }
 0x43e   :  { %v2620_v38 = vsub.f32 %v5246_v10, %v2550_v6  ;;  %3696 = vlog2.f32 %v2432_v0 }
 0x43f   :  { %v3687_v25 = vpop.eup %3686  ;;  %v2619_v41 = vsub.f32 %v5247_v21, %v2548_v40 }
 0x440   :  { %v3689_v37 = vpop.eup %3688  ;;  %2684 = vst [vmem:[%s5178_s7 + $0x1c8] sm:$0xff] %v2620_v38  ;;  %v2554_v14 = vmul.f32 0.6931472, %v3687_v25 }
 0x441   :  { %2683 = vst [vmem:[%s5178_s7 + $0x1c0] sm:$0xff] %v2619_v41  ;;  %v2552_v17 = vmul.f32 0.6931472, %v3689_v37 }
 0x442   :  { %v2622_v5 = vsub.f32 %v4895_v45, %v2554_v14 }
 0x443   :  { %v3691_v43 = vpop.eup %3690  ;;  %v2621_v8 = vsub.f32 %v5248_v28, %v2552_v17 }
 0x444   :  { %v3693_v1 = vpop.eup %3692  ;;  %2686 = vst [vmem:[%s5178_s7 + $0x1d8] sm:$0xff] %v2622_v5  ;;  %v2558_v19 = vmul.f32 0.6931472, %v3691_v43 }
 0x445   :  { %2685 = vst [vmem:[%s5178_s7 + $0x1d0] sm:$0xff] %v2621_v8  ;;  %v2556_v46 = vmul.f32 0.6931472, %v3693_v1 }
 0x446   :  { %v2624_v35 = vsub.f32 %v4903_v3, %v2558_v19 }
 0x447   :  { %v3695_v51 = vpop.eup %3694  ;;  %v2623_v49 = vsub.f32 %v4899_v59, %v2556_v46 }
 0x448   :  { %v3697_v45 = vpop.eup %3696  ;;  %2688 = vst [vmem:[%s5178_s7 + $0x1e8] sm:$0xff] %v2624_v35  ;;  %v2562_v20 = vmul.f32 0.6931472, %v3695_v51 }
 0x449   :  { %2687 = vst [vmem:[%s5178_s7 + $0x1e0] sm:$0xff] %v2623_v49  ;;  %v2560_v23 = vmul.f32 0.6931472, %v3697_v45 }
 0x44a   :  { %v2626_v16 = vsub.f32 %v5249_v15, %v2562_v20 }
 0x44b   :  { %v2625_v55 = vsub.f32 %v5250_v58, %v2560_v23 }
 0x44c   :  { %2690 = vst [vmem:[%s5178_s7 + $0x1f8] sm:$0xff] %v2626_v16 }
 0x44d   :  { %2689 = vst [vmem:[%s5178_s7 + $0x1f0] sm:$0xff] %v2625_v55 }

</bundles_post_ra>
